<compile_context>
chip_gen: v7x
topology: tpu7x:2x2x1
jax: 0.10.0
libtpu: 0.0.40
codegen_flags: <defaults>
</compile_context>

<pallas_src>
import functools
import math

import jax
import jax.numpy as jnp
from jax.experimental import pallas as pl
from jax.experimental.pallas import tpu as pltpu


def autopad(k, p=None, d=1):
    """Pad to 'same' shape outputs (same logic as the PyTorch helper)."""
    if d > 1:
        k = d * (k - 1) + 1 if isinstance(k, int) else [d * (x - 1) + 1 for x in k]
    if p is None:
        p = k // 2 if isinstance(k, int) else [x // 2 for x in k]
    return p


def _round_up(x, m):
    return ((x + m - 1) // m) * m


def _lcm(a, b):
    return a * b // math.gcd(a, b)


_HALO_BLK = 8          # sublane-aligned row block used to fetch the bottom halo rows


def _conv_bn_silu_kernel(*refs, kh, kw, stride, cin, th_in, w_out, halo,
                         tail_lo, chunks, g, n_dots, has_halo, apply_act):
    """One (TH x W_out x TC) output tile per grid step.

    refs (has_halo=True):  xa, xb, w, scale, bias, o, tail_scratch
    refs (has_halo=False): xa,     w, scale, bias, o

      xa:    (1, TH*stride, Wp, Cin)   current padded input row band (NHWC)
      xb:    (1, 8, Wp, Cin)           first rows of the next band (halo source)
      w:     (n_dots, g*Cin, TC)       conv taps, g taps folded per MXU contraction
      scale: (1, TC)  bias: (1, TC)    folded BatchNorm scale / bias (f32)
      o:     (1, TH*W_out, TC)         lane-dense flattened output slab
      tail:  (tail_rows, Wp, Cin)      scratch: band tail + bottom halo rows
    """
    if has_halo:
        xa_ref, xb_ref, w_ref, scale_ref, bias_ref, o_ref, tail_ref = refs
    else:
        xa_ref, w_ref, scale_ref, bias_ref, o_ref = refs
        xb_ref = tail_ref = None

    tc = o_ref.shape[2]

    # Stage only the rows needed past the current band (band tail + halo rows of
    # the next band) instead of copying the whole band into scratch.
    if has_halo:
        na = th_in - tail_lo
        tail_ref[0:na] = xa_ref[0, tail_lo:th_in]
        tail_ref[na:na + halo] = xb_ref[0, 0:halo]

    scale = scale_ref[...]
    bias = bias_ref[...]

    def load(use_tail, r0, rc, c0, cc):
        # (r0, c0) are input-plane coordinates of the first sample; rc x cc samples
        # are read with the convolution stride.
        if use_tail:
            r0 = r0 - tail_lo
            if stride == 1:
                return tail_ref[r0:r0 + rc, c0:c0 + cc, :]
            return tail_ref[pl.ds(r0, rc, stride=stride),
                            pl.ds(c0, cc, stride=stride), :]
        if stride == 1:
            return xa_ref[0, r0:r0 + rc, c0:c0 + cc, :]
        return xa_ref[0, pl.ds(r0, rc, stride=stride),
                      pl.ds(c0, cc, stride=stride), :]

    # Small per-chunk f32 accumulators (chunks chosen in the wrapper so each one
    # stays ~128-256 rows) -> no multi-hundred-KiB accumulator spilling to VMEM.
    for (r0, rc, c0, cc, use_tail) in chunks:
        m = rc * cc
        acc = jnp.zeros((m, tc), jnp.float32)
        for d in range(n_dots):
            parts = []
            for t in range(g):
                ky, kx = divmod(d * g + t, kw)
                p = load(use_tail, r0 * stride + ky, rc, c0 * stride + kx, cc)
                parts.append(p.reshape(m, cin))
            lhs = parts[0] if g == 1 else jnp.concatenate(parts, axis=-1)
            acc = acc + jnp.dot(lhs, w_ref[d], preferred_element_type=jnp.float32)
        y = acc * scale + bias
        if apply_act:
            y = y * jax.nn.sigmoid(y)          # SiLU
        off = r0 * w_out + c0
        o_ref[0, off:off + m, :] = y.astype(o_ref.dtype)


def _plan_chunks(th, *, stride, kh, w_out, halo, m_budget, u_out):
    """Static in-kernel work decomposition: tuple of (r0, rc, c0, cc, use_tail)."""
    th_in = th * stride
    raw = []
    if w_out <= m_budget:
        th_sub = max(u_out, (m_budget // w_out) // u_out * u_out)
        r0 = 0
        while r0 < th:
            rc = min(th_sub, th - r0)
            raw.append((r0, rc, 0, w_out))
            r0 += rc
    else:
        # Very wide rows: split a single output row into lane-aligned column chunks.
        wc = max(8, (m_budget // 8) * 8)
        for r in range(th):
            c0 = 0
            while c0 < w_out:
                cc = min(wc, w_out - c0)
                raw.append((r, 1, c0, cc))
                c0 += cc
    need = [(r0 + rc - 1) * stride + kh - 1 >= th_in for (r0, rc, c0, cc) in raw]
    if any(need):
        tail_lo = min(r0 * stride for (r0, rc, c0, cc), nd in zip(raw, need) if nd)
        tail_rows = th_in + halo - tail_lo
    else:
        tail_lo, tail_rows = 0, 0
    chunks = tuple((r0, rc, c0, cc, nd) for (r0, rc, c0, cc), nd in zip(raw, need))
    return chunks, tail_lo, tail_rows


def conv_bn_silu(x_nchw, weight_oihw, gamma, beta, running_mean, running_var,
                 *, stride=1, padding=None, dilation=1, groups=1, eps=1e-5,
                 apply_act=True, block_h=None, block_co=None, m_chunk_rows=None,
                 compute_dtype=None):
    """Equivalent of ultralytics Conv(c1, c2, k, s).forward(x) with fixed BN stats.

    x_nchw:      (N, Cin, H, W)
    weight_oihw: (Cout, Cin, KH, KW)
    Returns:     (N, Cout, Hout, Wout), same dtype as x.
    """
    if dilation != 1 or groups != 1:
        # TODO(synk): grouped / dilated taps.
        raise NotImplementedError("groups > 1 / dilation > 1 not implemented")

    n, c_in, h, w = x_nchw.shape
    c_out, c_in_w, kh, kw = weight_oihw.shape
    if c_in_w != c_in:
        raise ValueError("weight Cin mismatch")

    if padding is None:
        pad_h, pad_w = kh // 2, kw // 2                 # autopad ('same' for odd k)
    elif isinstance(padding, (tuple, list)):
        pad_h, pad_w = int(padding[0]), int(padding[1])
    else:
        pad_h = pad_w = int(padding)

    h_out = (h + 2 * pad_h - kh) // stride + 1
    w_out = (w + 2 * pad_w - kw) // stride + 1
    if h_out <= 0 or w_out <= 0:
        raise ValueError("non-positive output size")
    wp = w + 2 * pad_w

    halo = max(kh - stride, 0)                          # rows needed below each band
    if halo > _HALO_BLK:
        raise NotImplementedError("kernel height too large for the 8-row halo block")

    out_dtype = x_nchw.dtype
    cdt = jnp.dtype(compute_dtype) if compute_dtype is not None else jnp.dtype(out_dtype)
    x_bytes = cdt.itemsize

    # ---- Cout tiling: lane-dense, 256 wide when the MXU can use it ------------
    c_pad = _round_up(c_out, 128)
    if block_co is None:
        tc = 256 if (c_pad % 256 == 0 and c_pad >= 256) else 128
    else:
        tc = max(128, _round_up(min(int(block_co), c_pad), 128))
    while c_pad % tc:
        tc -= 128
    co_tiles = c_pad // tc

    # ---- tap folding: raise the MXU contraction K for small Cin ---------------
    if kh * kw * c_in <= 512:
        g = kh * kw                      # fold all taps (stem-like convs)
    elif kw * c_in <= 512:
        g = kw                           # fold one kernel row
    else:
        g = 1                            # Cin already MXU-friendly
    n_dots = (kh * kw) // g

    # ---- VMEM budget (v5e/v6e: 128 MiB physical, v7x: 64 MiB) -----------------
    try:
        phys_vmem = int(pltpu.get_tpu_info().vmem_capacity_bytes)
    except Exception:
        phys_vmem = 64 << 20
    budget = max(24 << 20, min(int(phys_vmem * 0.75), phys_vmem - (16 << 20)))

    # ---- H-row tile + in-kernel chunk plan -------------------------------------
    m_budget = int(m_chunk_rows) if m_chunk_rows is not None else max(64, 32768 // tc)
    u_out = 8 // math.gcd(w_out, 8)
    u_in = 8 // math.gcd(stride, 8)
    u = _lcm(u_out, u_in)                # th multiple of u keeps all blocks aligned
    th_max = _round_up(h_out, u)

    # Conservative VMEM estimate: the minor (Cin) dim of NHWC tiles is costed at
    # its 128-lane padded footprint.
    # TODO(synk): lane-dense (W*Cin) packing of the activations would remove that
    # padding waste (and the matching DMA bandwidth waste) for Cin << 128.
    lane_c = _round_up(c_in, 128)
    sub_w = _round_up(wp, 8)

    def _est_vmem(th_, chunks_, tail_rows_):
        th_in_ = th_ * stride
        xa = th_in_ * sub_w * lane_c * x_bytes
        xb = (_HALO_BLK * sub_w * lane_c * x_bytes) if halo > 0 else 0
        wgt = n_dots * _round_up(g * c_in, 8) * tc * x_bytes
        out = th_ * w_out * tc * x_bytes
        sb = 2 * 8 * tc * 4
        tail = tail_rows_ * sub_w * lane_c * x_bytes
        m_big = max(rc * cc for (_, rc, _, cc, _) in chunks_)
        work = m_big * tc * 4 + 2 * m_big * _round_up(g * c_in, 128) * x_bytes
        return 2 * (xa + xb + wgt + out + sb) + tail + work + (2 << 20)

    th = th_max if block_h is None else max(u, min(_round_up(int(block_h), u), th_max))
    while True:
        chunks, tail_lo, tail_rows = _plan_chunks(
            th, stride=stride, kh=kh, w_out=w_out, halo=halo,
            m_budget=m_budget, u_out=u_out)
        est = _est_vmem(th, chunks, tail_rows)
        if th <= u or (est <= budget and len(chunks) <= 48):
            break
        th -= u

    th_in = th * stride
    h_tiles = -(-h_out // th)
    h_out_pad = h_tiles * th
    m_full = th * w_out
    halo_step = th_in // _HALO_BLK       # th_in is a multiple of 8 by construction

    # ---- wrapper-side glue: layout, zero padding, BN folding -------------------
    # TODO(synk): keep activations in NHWC / flattened form across consecutive
    # Conv blocks so these transposes + pad only happen at network boundaries.
    hp_needed = h_tiles * th_in + (_HALO_BLK if halo > 0 else 0)
    hp = max(h + 2 * pad_h, hp_needed)
    x_nhwc = jnp.transpose(x_nchw, (0, 2, 3, 1)).astype(cdt)
    x_pad = jnp.pad(x_nhwc, ((0, 0), (pad_h, hp - h - pad_h), (pad_w, pad_w), (0, 0)))

    w_taps = jnp.transpose(weight_oihw, (2, 3, 1, 0)).reshape(kh * kw, c_in, c_out)
    w_taps = w_taps.reshape(n_dots, g * c_in, c_out)
    w_taps = jnp.pad(w_taps, ((0, 0), (0, 0), (0, c_pad - c_out))).astype(cdt)

    scale = gamma.astype(jnp.float32) / jnp.sqrt(running_var.astype(jnp.float32) + eps)
    bias = beta.astype(jnp.float32) - running_mean.astype(jnp.float32) * scale
    scale = jnp.pad(scale, (0, c_pad - c_out)).reshape(1, c_pad)
    bias = jnp.pad(bias, (0, c_pad - c_out)).reshape(1, c_pad)

    # ---- grid order: keep whichever operand is most expensive to re-stream -----
    in_stream = n * h_tiles * (th_in + (_HALO_BLK if halo > 0 else 0)) * wp * c_in * x_bytes
    wgt_bytes = kh * kw * c_in * c_pad * x_bytes
    h_inner = (co_tiles - 1) * in_stream <= n * (h_tiles - 1) * wgt_bytes
    if h_inner:                                   # weights resident across H tiles
        grid = (n, co_tiles, h_tiles)
        co_ix = lambda i, j: i
        hh_ix = lambda i, j: j
    else:                                         # input band resident across Cout tiles
        grid = (n, h_tiles, co_tiles)
        co_ix = lambda i, j: j
        hh_ix = lambda i, j: i

    in_specs = [pl.BlockSpec((1, th_in, wp, c_in),
                             lambda b, i, j: (b, hh_ix(i, j), 0, 0))]
    inputs = [x_pad]
    if halo > 0:
        in_specs.append(pl.BlockSpec(
            (1, _HALO_BLK, wp, c_in),
            lambda b, i, j: (b, (hh_ix(i, j) + 1) * halo_step, 0, 0)))
        inputs.append(x_pad)
    in_specs += [
        pl.BlockSpec((n_dots, g * c_in, tc), lambda b, i, j: (0, 0, co_ix(i, j))),
        pl.BlockSpec((1, tc), lambda b, i, j: (0, co_ix(i, j))),
        pl.BlockSpec((1, tc), lambda b, i, j: (0, co_ix(i, j))),
    ]
    inputs += [w_taps, scale, bias]
    scratch_shapes = [pltpu.VMEM((tail_rows, wp, c_in), cdt)] if halo > 0 else []

    kernel = functools.partial(
        _conv_bn_silu_kernel, kh=kh, kw=kw, stride=stride, cin=c_in, th_in=th_in,
        w_out=w_out, halo=halo, tail_lo=tail_lo, chunks=chunks, g=g, n_dots=n_dots,
        has_halo=(halo > 0), apply_act=apply_act)

    # One consistent estimate (already includes double-buffering) + headroom,
    # kept below the physical per-core VMEM.
    vmem_limit = int(max(32 << 20, min(est + (10 << 20), phys_vmem - (4 << 20))))

    out_flat = pl.pallas_call(
        kernel,
        out_shape=jax.ShapeDtypeStruct((n, h_out_pad * w_out, c_pad), out_dtype),
        grid_spec=pltpu.PrefetchScalarGridSpec(
            num_scalar_prefetch=0,
            grid=grid,
            in_specs=in_specs,
            out_specs=pl.BlockSpec((1, m_full, tc),
                                   lambda b, i, j: (b, hh_ix(i, j), co_ix(i, j))),
            scratch_shapes=scratch_shapes,
        ),
        compiler_params=pltpu.CompilerParams(
            dimension_semantics=("parallel", "parallel", "parallel"),
            vmem_limit_bytes=vmem_limit,
        ),
    )(*inputs)

    out = out_flat.reshape(n, h_out_pad, w_out, c_pad)[:, :h_out, :, :c_out]
    return jnp.transpose(out, (0, 3, 1, 2)).astype(out_dtype)   # back to NCHW


# ------------------------------ self test -------------------------------------
def _reference(x, w, gamma, beta, mean, var, *, stride, pad, eps=1e-5):
    y = jax.lax.conv_general_dilated(
        x.astype(jnp.float32), w.astype(jnp.float32),
        window_strides=(stride, stride),
        padding=((pad, pad), (pad, pad)),
        dimension_numbers=("NCHW", "OIHW", "NCHW"))
    s = (gamma / jnp.sqrt(var + eps)).reshape(1, -1, 1, 1)
    b = (beta - mean * gamma / jnp.sqrt(var + eps)).reshape(1, -1, 1, 1)
    y = y * s + b
    return y * jax.nn.sigmoid(y)


def _run_case(key, *, n, c1, c2, hw, k, s, dtype=jnp.float32, tol=5e-4,
              m_chunk_rows=None):
    kx, kw_, kg, kb, km, kv = jax.random.split(key, 6)
    x = jax.random.normal(kx, (n, c1, hw, hw), jnp.float32)
    weight = jax.random.normal(kw_, (c2, c1, k, k), jnp.float32) * 0.1
    gamma = 1.0 + 0.1 * jax.random.normal(kg, (c2,), jnp.float32)
    beta = 0.1 * jax.random.normal(kb, (c2,), jnp.float32)
    mean = 0.05 * jax.random.normal(km, (c2,), jnp.float32)
    var = 1.0 + 0.1 * jax.random.uniform(kv, (c2,), jnp.float32)

    out = conv_bn_silu(x.astype(dtype), weight.astype(dtype), gamma, beta, mean,
                       var, stride=s, m_chunk_rows=m_chunk_rows)
    out = jax.block_until_ready(out)

    pad = autopad(k)
    ref = _reference(x, weight, gamma, beta, mean, var, stride=s, pad=pad)
    assert out.shape == ref.shape, (out.shape, ref.shape)
    err = float(jnp.max(jnp.abs(out.astype(jnp.float32) - ref)))
    assert err < tol, (err, tol)
    return err


if __name__ == "__main__":
    key = jax.random.PRNGKey(0)
    ks = jax.random.split(key, 5)
    # Conv(4, 8, k=3, s=1): tiny Cin -> all 9 taps folded into one K=36 matmul.
    _run_case(ks[0], n=2, c1=4, c2=8, hw=16, k=3, s=1)
    # Conv(8, 160, k=3, s=1): Cout padded to 256 -> single TC=256 Cout tile,
    # multi-chunk accumulator with a small staged tail.
    _run_case(ks[1], n=1, c1=8, c2=160, hw=12, k=3, s=1)
    # Conv(16, 32, k=1, s=1): pointwise conv, no halo / no tail scratch.
    _run_case(ks[2], n=1, c1=16, c2=32, hw=16, k=1, s=1)
    # Conv(8, 16, k=3, s=2): strided downsampling conv (pl.ds strided reads), odd HW.
    _run_case(ks[3], n=1, c1=8, c2=16, hw=17, k=3, s=2)
    # bf16 operands (f32 MXU accumulation) + forced tiny M chunks to exercise the
    # in-kernel W-chunk path.
    _run_case(ks[4], n=1, c1=4, c2=8, hw=16, k=3, s=1, dtype=jnp.bfloat16,
              tol=3e-2, m_chunk_rows=8)
    print("KERNEL_OK")
</pallas_src>

<mosaic_0001>
module attributes {stable_mosaic.version = 11 : i64} {
  func.func @_conv_bn_silu_kernel(%arg0: i32, %arg1: i32, %arg2: i32, %arg3: memref<1x16x18x4xf32, #tpu.memory_space<vmem>>, %arg4: memref<1x8x18x4xf32, #tpu.memory_space<vmem>>, %arg5: memref<1x36x128xf32, #tpu.memory_space<vmem>>, %arg6: memref<1x128xf32, #tpu.memory_space<vmem>>, %arg7: memref<1x128xf32, #tpu.memory_space<vmem>>, %arg8: memref<1x256x128xf32, #tpu.memory_space<vmem>>, %arg9: memref<18x18x4xf32, #tpu.memory_space<vmem>>) attributes {dimension_semantics = [#tpu.dimension_semantics<parallel>, #tpu.dimension_semantics<parallel>, #tpu.dimension_semantics<parallel>], iteration_bounds = array<i64: 2, 1, 1>, scalar_prefetch = 0 : i64, scratch_operands = 1 : i64, tpu.core_type = #tpu.core_type<tc>, window_params = [{transform_indices = @transform_0, window_bounds = array<i64: 1, 16, 18, 4>}, {transform_indices = @transform_1, window_bounds = array<i64: 1, 8, 18, 4>}, {transform_indices = @transform_2, window_bounds = array<i64: 1, 36, 128>}, {transform_indices = @transform_3, window_bounds = array<i64: 1, 128>}, {transform_indices = @transform_4, window_bounds = array<i64: 1, 128>}, {transform_indices = @transform_5, window_bounds = array<i64: 1, 256, 128>}]} {
    %c0 = arith.constant 0 : index
    %c0_0 = arith.constant 0 : index
    %c0_1 = arith.constant 0 : index
    %c0_2 = arith.constant 0 : index
    %0 = vector.load %arg3[%c0, %c0_0, %c0_1, %c0_2] : memref<1x16x18x4xf32, #tpu.memory_space<vmem>>, vector<1x16x18x4xf32>
    %1 = vector.shape_cast %0 : vector<1x16x18x4xf32> to vector<16x18x4xf32>
    %c0_3 = arith.constant 0 : index
    %c0_4 = arith.constant 0 : index
    %c0_5 = arith.constant 0 : index
    %2 = vector.load %arg9[%c0_3, %c0_4, %c0_5] : memref<18x18x4xf32, #tpu.memory_space<vmem>>, vector<16x18x4xf32>
    tpu.vector_store %arg9[%c0_3, %c0_4, %c0_5], %1 {strides = array<i32>} : memref<18x18x4xf32, #tpu.memory_space<vmem>>, vector<16x18x4xf32>,
    %c0_6 = arith.constant 0 : index
    %c0_7 = arith.constant 0 : index
    %c0_8 = arith.constant 0 : index
    %c0_9 = arith.constant 0 : index
    %3 = vector.load %arg4[%c0_6, %c0_7, %c0_8, %c0_9] : memref<1x8x18x4xf32, #tpu.memory_space<vmem>>, vector<1x2x18x4xf32>
    %4 = vector.shape_cast %3 : vector<1x2x18x4xf32> to vector<2x18x4xf32>
    %c16 = arith.constant 16 : index
    %c0_10 = arith.constant 0 : index
    %c0_11 = arith.constant 0 : index
    %5 = vector.load %arg9[%c16, %c0_10, %c0_11] : memref<18x18x4xf32, #tpu.memory_space<vmem>>, vector<2x18x4xf32>
    tpu.vector_store %arg9[%c16, %c0_10, %c0_11], %4 {strides = array<i32>} : memref<18x18x4xf32, #tpu.memory_space<vmem>>, vector<2x18x4xf32>,
    %c0_12 = arith.constant 0 : index
    %c0_13 = arith.constant 0 : index
    %6 = vector.load %arg6[%c0_12, %c0_13] : memref<1x128xf32, #tpu.memory_space<vmem>>, vector<1x128xf32>
    %c0_14 = arith.constant 0 : index
    %c0_15 = arith.constant 0 : index
    %7 = vector.load %arg7[%c0_14, %c0_15] : memref<1x128xf32, #tpu.memory_space<vmem>>, vector<1x128xf32>
    %cst = arith.constant 0.000000e+00 : f32
    %8 = vector.broadcast %cst : f32 to vector<256x128xf32>
    %c0_16 = arith.constant 0 : index
    %c0_17 = arith.constant 0 : index
    %c0_18 = arith.constant 0 : index
    %9 = vector.load %arg9[%c0_16, %c0_17, %c0_18] : memref<18x18x4xf32, #tpu.memory_space<vmem>>, vector<16x16x4xf32>
    %10 = vector.shape_cast %9 : vector<16x16x4xf32> to vector<256x4xf32>
    %c0_19 = arith.constant 0 : index
    %c1 = arith.constant 1 : index
    %c0_20 = arith.constant 0 : index
    %11 = vector.load %arg9[%c0_19, %c1, %c0_20] : memref<18x18x4xf32, #tpu.memory_space<vmem>>, vector<16x16x4xf32>
    %12 = vector.shape_cast %11 : vector<16x16x4xf32> to vector<256x4xf32>
    %c0_21 = arith.constant 0 : index
    %c2 = arith.constant 2 : index
    %c0_22 = arith.constant 0 : index
    %13 = vector.load %arg9[%c0_21, %c2, %c0_22] : memref<18x18x4xf32, #tpu.memory_space<vmem>>, vector<16x16x4xf32>
    %14 = vector.shape_cast %13 : vector<16x16x4xf32> to vector<256x4xf32>
    %c1_23 = arith.constant 1 : index
    %c0_24 = arith.constant 0 : index
    %c0_25 = arith.constant 0 : index
    %15 = vector.load %arg9[%c1_23, %c0_24, %c0_25] : memref<18x18x4xf32, #tpu.memory_space<vmem>>, vector<16x16x4xf32>
    %16 = vector.shape_cast %15 : vector<16x16x4xf32> to vector<256x4xf32>
    %c1_26 = arith.constant 1 : index
    %c1_27 = arith.constant 1 : index
    %c0_28 = arith.constant 0 : index
    %17 = vector.load %arg9[%c1_26, %c1_27, %c0_28] : memref<18x18x4xf32, #tpu.memory_space<vmem>>, vector<16x16x4xf32>
    %18 = vector.shape_cast %17 : vector<16x16x4xf32> to vector<256x4xf32>
    %c1_29 = arith.constant 1 : index
    %c2_30 = arith.constant 2 : index
    %c0_31 = arith.constant 0 : index
    %19 = vector.load %arg9[%c1_29, %c2_30, %c0_31] : memref<18x18x4xf32, #tpu.memory_space<vmem>>, vector<16x16x4xf32>
    %20 = vector.shape_cast %19 : vector<16x16x4xf32> to vector<256x4xf32>
    %c2_32 = arith.constant 2 : index
    %c0_33 = arith.constant 0 : index
    %c0_34 = arith.constant 0 : index
    %21 = vector.load %arg9[%c2_32, %c0_33, %c0_34] : memref<18x18x4xf32, #tpu.memory_space<vmem>>, vector<16x16x4xf32>
    %22 = vector.shape_cast %21 : vector<16x16x4xf32> to vector<256x4xf32>
    %c2_35 = arith.constant 2 : index
    %c1_36 = arith.constant 1 : index
    %c0_37 = arith.constant 0 : index
    %23 = vector.load %arg9[%c2_35, %c1_36, %c0_37] : memref<18x18x4xf32, #tpu.memory_space<vmem>>, vector<16x16x4xf32>
    %24 = vector.shape_cast %23 : vector<16x16x4xf32> to vector<256x4xf32>
    %c2_38 = arith.constant 2 : index
    %c2_39 = arith.constant 2 : index
    %c0_40 = arith.constant 0 : index
    %25 = vector.load %arg9[%c2_38, %c2_39, %c0_40] : memref<18x18x4xf32, #tpu.memory_space<vmem>>, vector<16x16x4xf32>
    %26 = vector.shape_cast %25 : vector<16x16x4xf32> to vector<256x4xf32>
    %27 = tpu.concatenate %10, %12, %14, %16, %18, %20, %22, %24, %26 in 1 : vector<256x4xf32>, vector<256x4xf32>, vector<256x4xf32>, vector<256x4xf32>, vector<256x4xf32>, vector<256x4xf32>, vector<256x4xf32>, vector<256x4xf32>, vector<256x4xf32> -> vector<256x36xf32>
    %c0_41 = arith.constant 0 : index
    %c0_42 = arith.constant 0 : index
    %c0_43 = arith.constant 0 : index
    %28 = vector.load %arg5[%c0_41, %c0_42, %c0_43] : memref<1x36x128xf32, #tpu.memory_space<vmem>>, vector<1x36x128xf32>
    %29 = vector.shape_cast %28 : vector<1x36x128xf32> to vector<36x128xf32>
    %cst_44 = arith.constant dense<0.000000e+00> : vector<256x128xf32>
    %30 = tpu.matmul %27, %29, %cst_44 {dimension_numbers = #tpu.dot_dimension_numbers<[1], [0], [0], [1], [0, 0, 1, 1], [], []>} : vector<256x36xf32>, vector<36x128xf32>, vector<256x128xf32> -> vector<256x128xf32>
    %31 = arith.addf %8, %30 : vector<256x128xf32>
    %32 = vector.broadcast %6 : vector<1x128xf32> to vector<256x128xf32>
    %33 = arith.mulf %31, %32 : vector<256x128xf32>
    %34 = vector.broadcast %7 : vector<1x128xf32> to vector<256x128xf32>
    %35 = arith.addf %33, %34 : vector<256x128xf32>
    %36 = arith.negf %35 : vector<256x128xf32>
    %37 = math.exp %36 : vector<256x128xf32>
    %cst_45 = arith.constant 1.000000e+00 : f32
    %38 = vector.broadcast %cst_45 : f32 to vector<256x128xf32>
    %39 = arith.addf %38, %37 : vector<256x128xf32>
    %40 = arith.divf %38, %39 : vector<256x128xf32>
    %41 = arith.mulf %35, %40 : vector<256x128xf32>
    %c0_46 = arith.constant 0 : index
    %c0_47 = arith.constant 0 : index
    %c0_48 = arith.constant 0 : index
    %42 = vector.load %arg8[%c0_46, %c0_47, %c0_48] : memref<1x256x128xf32, #tpu.memory_space<vmem>>, vector<1x256x128xf32>
    %43 = vector.shape_cast %42 : vector<1x256x128xf32> to vector<256x128xf32>
    %44 = vector.shape_cast %41 : vector<256x128xf32> to vector<1x256x128xf32>
    tpu.vector_store %arg8[%c0_46, %c0_47, %c0_48], %44 {strides = array<i32>} : memref<1x256x128xf32, #tpu.memory_space<vmem>>, vector<1x256x128xf32>,
    return
  }
  func.func @transform_0(%arg0: i32, %arg1: i32, %arg2: i32) -> (i32, i32, i32, i32) {
    %c0_i32 = arith.constant 0 : i32
    %c0_i32_0 = arith.constant 0 : i32
    %c0_i32_1 = arith.constant 0 : i32
    return %arg0, %arg2, %c0_i32, %c0_i32_0 : i32, i32, i32, i32
  }
  func.func @transform_1(%arg0: i32, %arg1: i32, %arg2: i32) -> (i32, i32, i32, i32) {
    %c1_i32 = arith.constant 1 : i32
    %0 = arith.addi %arg2, %c1_i32 : i32
    %c2_i32 = arith.constant 2 : i32
    %1 = arith.muli %0, %c2_i32 : i32
    %c0_i32 = arith.constant 0 : i32
    %c0_i32_0 = arith.constant 0 : i32
    %c0_i32_1 = arith.constant 0 : i32
    return %arg0, %1, %c0_i32, %c0_i32_0 : i32, i32, i32, i32
  }
  func.func @transform_2(%arg0: i32, %arg1: i32, %arg2: i32) -> (i32, i32, i32) {
    %c0_i32 = arith.constant 0 : i32
    %c0_i32_0 = arith.constant 0 : i32
    %c0_i32_1 = arith.constant 0 : i32
    return %c0_i32, %c0_i32_0, %arg1 : i32, i32, i32
  }
  func.func @transform_3(%arg0: i32, %arg1: i32, %arg2: i32) -> (i32, i32) {
    %c0_i32 = arith.constant 0 : i32
    %c0_i32_0 = arith.constant 0 : i32
    return %c0_i32, %arg1 : i32, i32
  }
  func.func @transform_4(%arg0: i32, %arg1: i32, %arg2: i32) -> (i32, i32) {
    %c0_i32 = arith.constant 0 : i32
    %c0_i32_0 = arith.constant 0 : i32
    return %c0_i32, %arg1 : i32, i32
  }
  func.func @transform_5(%arg0: i32, %arg1: i32, %arg2: i32) -> (i32, i32, i32) {
    %c0_i32 = arith.constant 0 : i32
    return %arg0, %arg2, %arg1 : i32, i32, i32
  }
}

</mosaic_0001>

<bundles_post_ra>
// kernel: tpu_custom_call.1
= control target key start
LH: loop header
LB: loop body
LE: loop exit
PB: predicated region body
PF: predicated region fallthrough
CT: control target
= control target key end

     0   :  { %10 = vsyncpa [#allocation4], 0  ;;  %s5099_s0 = inlined_call_operand.vmem [shape: f32[2,24,18,4], index: 0, kind: input, shape index: {}]   ;;  %s5100_s1 = inlined_call_operand.vmem [shape: f32[2,24,18,4], index: 1, kind: input, shape index: {}]   ;;  %s5101_s2 = inlined_call_operand.vmem [shape: f32[1,36,128], index: 2, kind: input, shape index: {}]   ;;  %s5102_s3 = inlined_call_operand.vmem [shape: f32[1,128], index: 3, kind: input, shape index: {}]   ;;  %s5103_s4 = inlined_call_operand.vmem [shape: f32[1,128], index: 4, kind: input, shape index: {}]   ;;  %s5104_s5 = inlined_call_operand.hbm [shape: f32[2,256,128], index: 5, kind: output, shape index: {}]  }
   0x1   :  { %12 = vsyncpa [#allocation4 + $0x1], 0  ;;  %s3425_s18 = smov 0   ;;  %s3427_s19 = smov 0  }
   0x2   :  { %s3429_s20 = smov 0   ;;  %s3431_s21 = smov 0  }
   0x3   :  { %s3433_s22 = smov 0   ;;  %s3435_s23 = smov 0  }
   0x4 LB: > { %s2905_s24 = sadd.s32 4294967295, %s3383_s23   ;;  %s2906_s25 = sadd.s32 4294967294, %s3383_s23   ;;  %s3383_s23 = sphi %s3435_s23, %s18_s23   ;;  %s3379_s22 = sphi %s3433_s22, %s5224_s22   ;;  %s3375_s21 = sphi %s3431_s21, %s5223_s21   ;;  %s3371_s20 = sphi %s3429_s20, %s5222_s20   ;;  %s3367_s19 = sphi %s3427_s19, %s5221_s19   ;;  %s3363_s18 = sphi %s3425_s18, %s5220_s18  }
   0x5   : > { %s37_s26 = sadd.s32 1, %s3379_s22  ;;  %s186_s27 = sadd.s32 1, %s3371_s20 }
   0x6   : > { %p39_p0 = scmp.ge.s32.totalorder %s37_s26, 2  ;;  %p196_p1 = scmp.ne.s32.totalorder %s3371_s20, %s3367_s19 }
   0x7   : > { %p197_p2 = scmp.eq.s32.totalorder %s2905_s24, 1  ;;  %p202_p3 = scmp.ne.s32.totalorder %s3367_s19, %s3363_s18 }
   0x8   : > { %s5226_s26 = smov (%p39_p0, %s37_s26), 0  ;;  %p203_p5 = scmp.eq.s32.totalorder %s2906_s25, 1 }
   0x9   : > { %p3465_p4 = por %p197_p2, %p196_p1  ;;  %s179_s29 = ssub.s32 %s3379_s22, %s5226_s26 }
   0xa   : > { %p2912_p6 = scmp.ge.s32.totalorder %s3383_s23, 1  ;;  %p184_p7 = scmp.eq.s32.totalorder %s179_s29, 0 }
   0xb   : > { %p3472_p8 = por %p203_p5, %p202_p3  ;;  %p282_p9 = scmp.lt.s32.totalorder %s3383_s23, 3 }
   0xc   : > { %s3478_s6 = scalar_select %p184_p7, %s3371_s20, %s186_s27  }
   0xd   : > { %p283_p10 = pnand %p2912_p6, %p282_p9 }
   0xf   : > { %286 = sbr.rel (%p283_p10) target bundleno = 928 (0x3a0), region = 40 }
  0x16   : > { %p348_p11 = scmp.lt.s32.totalorder %s3375_s21, 1  ;;  %vm437_vm0 = vcmask 31744   ;;  %vm440_vm1 = vcmask 25600   ;;  %s3385_s12 = smov 4   ;;  %vm1848_vm2 = vcmask 64512   ;;  %vm2181_vm3 = vcmask 1043456  }
  0x17   : > { %s3386_s13 = smov 8   ;;  %s3387_s14 = smov 12   ;;  %vm1881_vm4 = vcmask 97280   ;;  %vm1914_vm5 = vcmask 130048   ;;  %vm1947_vm6 = vcmask 162816   ;;  %vm1980_vm7 = vcmask 195584  }
  0x18   : > { %s3482_s7 = scalar_select %p348_p11, %s3375_s21, 1  ;;  %vm2013_vm8 = vcmask 228352   ;;  %vm2046_vm9 = vcmask 261120   ;;  %vm2084_vm10 = vcmask 293888  }
  0x19   : > { %s3388_s15 = smov 16   ;;  %s3389_s16 = smov 20  }
  0x1a   : > { %s3100_s8 = smul.u32 576, %s3482_s7  ;;  %s3390_s17 = smov 24  }
  0x1b   : > { %s3391_s24 = smov 28   ;;  %s3392_s9 = smov 32  }
  0x1c   : > { %s3490_s11 = scalar_lea.vmem %s5099_s0, %s3100_s8  ;;  %s2989_s10 = sadd.s32 384, %s3100_s8 }
  0x1d   : > { %v392_v0 = vld [vmem:[%s3490_s11 + $0x18] sm:$0xff]  ;;  %v393_v1 = vld [vmem:[%s3490_s11 + $0x20] sm:$0xff]  ;;  %v390_v3 = vld [vmem:[%s3490_s11 + $0x8] sm:$0xff]  ;;  %s4195_s25 = scalar_lea.vmem %s5100_s1, %s2989_s10  ;;  %s2990_s27 = sshll.u32 %s3375_s21, 12 }
  0x1e   : > { %v389_v2 = vld [vmem:[%s3490_s11] sm:$0xff]  ;;  %442 = vst.msk [vmem:[#allocation2 + $0x18] sm:$0xff] %vm437_vm0, %v392_v0  ;;  %443 = vst.msk [vmem:[#allocation2 + $0x20] sm:$0xff] %vm437_vm0, %v393_v1  ;;  %v394_v4 = vld [vmem:[%s3490_s11 + $0x28] sm:$0x3] }
  0x1f   : > { %438 = vst.msk [vmem:[#allocation2] sm:$0xff] %vm437_vm0, %v389_v2  ;;  %v391_v5 = vld [vmem:[%s3490_s11 + $0x10] sm:$0x3]  ;;  %439 = vst.msk [vmem:[#allocation2 + $0x8] sm:$0xff] %vm437_vm0, %v390_v3  ;;  %v396_v6 = vld [vmem:[%s3490_s11 + $0x38] sm:$0xff] }
  0x20   : > { %444 = vst.msk [vmem:[#allocation2 + $0x28] sm:$0x3] %vm440_vm1, %v394_v4  ;;  %441 = vst.msk [vmem:[#allocation2 + $0x10] sm:$0x3] %vm440_vm1, %v391_v5  ;;  %v397_v7 = vld [vmem:[%s3490_s11 + $0x40] sm:$0x3] }
  0x21   : > { %v395_v8 = vld [vmem:[%s3490_s11 + $0x30] sm:$0xff]  ;;  %446 = vst.msk [vmem:[#allocation2 + $0x38] sm:$0xff] %vm437_vm0, %v396_v6  ;;  %v400_v10 = vld [vmem:[%s3490_s11 + $0x58] sm:$0x3]  ;;  %v398_v11 = vld [vmem:[%s3490_s11 + $0x48] sm:$0xff] }
  0x22   : > { %447 = vst.msk [vmem:[#allocation2 + $0x40] sm:$0x3] %vm440_vm1, %v397_v7  ;;  %v399_v9 = vld [vmem:[%s3490_s11 + $0x50] sm:$0xff]  ;;  %450 = vst.msk [vmem:[#allocation2 + $0x58] sm:$0x3] %vm440_vm1, %v400_v10  ;;  %v402_v12 = vld [vmem:[%s3490_s11 + $0x68] sm:$0xff] }
  0x23   : > { %445 = vst.msk [vmem:[#allocation2 + $0x30] sm:$0xff] %vm437_vm0, %v395_v8  ;;  %449 = vst.msk [vmem:[#allocation2 + $0x50] sm:$0xff] %vm437_vm0, %v399_v9  ;;  %v403_v13 = vld [vmem:[%s3490_s11 + $0x70] sm:$0x3]  ;;  %v401_v14 = vld [vmem:[%s3490_s11 + $0x60] sm:$0xff] }
  0x24   : > { %448 = vst.msk [vmem:[#allocation2 + $0x48] sm:$0xff] %vm437_vm0, %v398_v11  ;;  %452 = vst.msk [vmem:[#allocation2 + $0x68] sm:$0xff] %vm437_vm0, %v402_v12  ;;  %v405_v15 = vld [vmem:[%s3490_s11 + $0x80] sm:$0xff]  ;;  %v406_v16 = vld [vmem:[%s3490_s11 + $0x88] sm:$0x3] }
  0x25   : > { %453 = vst.msk [vmem:[#allocation2 + $0x70] sm:$0x3] %vm440_vm1, %v403_v13  ;;  %v404_v17 = vld [vmem:[%s3490_s11 + $0x78] sm:$0xff]  ;;  %456 = vst.msk [vmem:[#allocation2 + $0x88] sm:$0x3] %vm440_vm1, %v406_v16  ;;  %v407_v20 = vld [vmem:[%s3490_s11 + $0x90] sm:$0xff] }
  0x26   : > { %451 = vst.msk [vmem:[#allocation2 + $0x60] sm:$0xff] %vm437_vm0, %v401_v14  ;;  %455 = vst.msk [vmem:[#allocation2 + $0x80] sm:$0xff] %vm437_vm0, %v405_v15  ;;  %v408_v18 = vld [vmem:[%s3490_s11 + $0x98] sm:$0xff]  ;;  %v409_v19 = vld [vmem:[%s3490_s11 + $0xa0] sm:$0x3] }
  0x27   : > { %454 = vst.msk [vmem:[#allocation2 + $0x78] sm:$0xff] %vm437_vm0, %v404_v17  ;;  %458 = vst.msk [vmem:[#allocation2 + $0x98] sm:$0xff] %vm437_vm0, %v408_v18  ;;  %v411_v21 = vld [vmem:[%s3490_s11 + $0xb0] sm:$0xff]  ;;  %v412_v22 = vld [vmem:[%s3490_s11 + $0xb8] sm:$0x3] }
  0x28   : > { %459 = vst.msk [vmem:[#allocation2 + $0xa0] sm:$0x3] %vm440_vm1, %v409_v19  ;;  %v410_v23 = vld [vmem:[%s3490_s11 + $0xa8] sm:$0xff]  ;;  %v3537_v24 = vld [vmem:[#allocation2 + $0x19] sm:$0xff]  ;;  %462 = vst.msk [vmem:[#allocation2 + $0xb8] sm:$0x3] %vm440_vm1, %v412_v22 }
  0x29   : > { %457 = vst.msk [vmem:[#allocation2 + $0x90] sm:$0xff] %vm437_vm0, %v407_v20  ;;  %461 = vst.msk [vmem:[#allocation2 + $0xb0] sm:$0xff] %vm437_vm0, %v411_v21  ;;  %v414_v25 = vld [vmem:[%s3490_s11 + $0xc8] sm:$0xff]  ;;  %v415_v26 = vld [vmem:[%s3490_s11 + $0xd0] sm:$0x3]  ;;  %828 = vrot.lane.b32.xlu1 %v3537_v24, %s3385_s12 }
  0x2a   : > { %460 = vst.msk [vmem:[#allocation2 + $0xa8] sm:$0xff] %vm437_vm0, %v410_v23  ;;  %v534_v27 = vld [vmem:[#allocation2 + $0x1] sm:$0xff]  ;;  %464 = vst.msk [vmem:[#allocation2 + $0xc8] sm:$0xff] %vm437_vm0, %v414_v25  ;;  %v535_v30 = vld [vmem:[#allocation2 + $0x9] sm:$0xff] }
  0x2b   : > { %465 = vst.msk [vmem:[#allocation2 + $0xd0] sm:$0x3] %vm440_vm1, %v415_v26  ;;  %824 = vrot.lane.b32.xlu0 %v534_v27, %s3385_s12  ;;  %v3549_v28 = vld [vmem:[#allocation2 + $0x21] sm:$0xff]  ;;  %v416_v33 = vld [vmem:[%s3490_s11 + $0xd8] sm:$0xff]  ;;  %v419_v39 = vld [vmem:[%s3490_s11 + $0xf0] sm:$0xff] }
  0x2c   : > { %v413_v29 = vld [vmem:[%s3490_s11 + $0xc0] sm:$0xff]  ;;  %v418_v32 = vld [vmem:[%s3490_s11 + $0xe8] sm:$0x3]  ;;  %466 = vst.msk [vmem:[#allocation2 + $0xd8] sm:$0xff] %vm437_vm0, %v416_v33  ;;  %v420_v35 = vld [vmem:[%s3490_s11 + $0xf8] sm:$0xff] }
  0x2d   : > { %463 = vst.msk [vmem:[#allocation2 + $0xc0] sm:$0xff] %vm437_vm0, %v413_v29  ;;  %v417_v31 = vld [vmem:[%s3490_s11 + $0xe0] sm:$0xff]  ;;  %830 = vrot.lane.b32.xlu1 %v3549_v28, %s3385_s12  ;;  %v3565_v36 = vld [vmem:[#allocation2 + $0x31] sm:$0xff]  ;;  %470 = vst.msk [vmem:[#allocation2 + $0xf8] sm:$0xff] %vm437_vm0, %v420_v35 }
  0x2e   : > { %467 = vst.msk [vmem:[#allocation2 + $0xe0] sm:$0xff] %vm437_vm0, %v417_v31  ;;  %v3561_v34 = vld [vmem:[#allocation2 + $0x39] sm:$0xff]  ;;  %v3569_v38 = vld [vmem:[#allocation2 + $0x51] sm:$0xff]  ;;  %469 = vst.msk [vmem:[#allocation2 + $0xf0] sm:$0xff] %vm437_vm0, %v419_v39 }
  0x2f   : > { %468 = vst.msk [vmem:[#allocation2 + $0xe8] sm:$0x3] %vm440_vm1, %v418_v32  ;;  %826 = vrot.lane.b32.xlu0 %v535_v30, %s3385_s12  ;;  %v421_v37 = vld [vmem:[%s3490_s11 + $0x100] sm:$0x3]  ;;  %v423_v40 = vld [vmem:[%s3490_s11 + $0x110] sm:$0xff]  ;;  %v422_v42 = vld [vmem:[%s3490_s11 + $0x108] sm:$0xff] }
  0x30   : > { %471 = vst.msk [vmem:[#allocation2 + $0x100] sm:$0x3] %vm440_vm1, %v421_v37  ;;  %v424_v41 = vld [vmem:[%s3490_s11 + $0x118] sm:$0x3]  ;;  %v426_v43 = vld [vmem:[%s3490_s11 + $0x128] sm:$0xff]  ;;  %v425_v46 = vld [vmem:[%s3490_s11 + $0x120] sm:$0xff] }
  0x31   : > { %834 = vrot.lane.b32.xlu1 %v3561_v34, %s3385_s12  ;;  %473 = vst.msk [vmem:[#allocation2 + $0x110] sm:$0xff] %vm437_vm0, %v423_v40  ;;  %v3583_v44 = vld [vmem:[#allocation2 + $0x49] sm:$0xff]  ;;  %472 = vst.msk [vmem:[#allocation2 + $0x108] sm:$0xff] %vm437_vm0, %v422_v42  ;;  %v429_v47 = vld [vmem:[%s3490_s11 + $0x140] sm:$0xff] }
  0x32   : > { %474 = vst.msk [vmem:[#allocation2 + $0x118] sm:$0x3] %vm440_vm1, %v424_v41  ;;  %v427_v45 = vld [vmem:[%s3490_s11 + $0x130] sm:$0x3]  ;;  %v430_v48 = vld [vmem:[%s3490_s11 + $0x148] sm:$0x3] }
  0x33   : > { %832 = vrot.lane.b32.xlu0 %v3565_v36, %s3385_s12  ;;  %476 = vst.msk [vmem:[#allocation2 + $0x128] sm:$0xff] %vm437_vm0, %v426_v43  ;;  %475 = vst.msk [vmem:[#allocation2 + $0x120] sm:$0xff] %vm437_vm0, %v425_v46  ;;  %v428_v49 = vld [vmem:[%s3490_s11 + $0x138] sm:$0xff]  ;;  %v433_v51 = vld [vmem:[%s3490_s11 + $0x160] sm:$0x3] }
  0x34   : > { %477 = vst.msk [vmem:[#allocation2 + $0x130] sm:$0x3] %vm440_vm1, %v427_v45  ;;  %480 = vst.msk [vmem:[#allocation2 + $0x148] sm:$0x3] %vm440_vm1, %v430_v48  ;;  %v432_v50 = vld [vmem:[%s3490_s11 + $0x158] sm:$0xff]  ;;  %v431_v52 = vld [vmem:[%s3490_s11 + $0x150] sm:$0xff] }
  0x35   : > { %479 = vst.msk [vmem:[#allocation2 + $0x140] sm:$0xff] %vm437_vm0, %v429_v47  ;;  %478 = vst.msk [vmem:[#allocation2 + $0x138] sm:$0xff] %vm437_vm0, %v428_v49  ;;  %838 = vrot.lane.b32.xlu1 %v3569_v38, %s3385_s12  ;;  %v435_v53 = vld [vmem:[%s3490_s11 + $0x170] sm:$0xff]  ;;  %v436_v55 = vld [vmem:[%s3490_s11 + $0x178] sm:$0x3] }
  0x36   : > { %482 = vst.msk [vmem:[#allocation2 + $0x158] sm:$0xff] %vm437_vm0, %v432_v50  ;;  %v543_v54 = vld [vmem:[#allocation2 + $0x69] sm:$0xff]  ;;  %481 = vst.msk [vmem:[#allocation2 + $0x150] sm:$0xff] %vm437_vm0, %v431_v52  ;;  %v542_v57 = vld [vmem:[#allocation2 + $0x61] sm:$0xff] }
  0x37   : > { %483 = vst.msk [vmem:[#allocation2 + $0x160] sm:$0x3] %vm440_vm1, %v433_v51  ;;  %836 = vrot.lane.b32.xlu0 %v3583_v44, %s3385_s12  ;;  %v434_v56 = vld [vmem:[%s3490_s11 + $0x168] sm:$0xff]  ;;  %486 = vst.msk [vmem:[#allocation2 + $0x178] sm:$0x3] %vm440_vm1, %v436_v55  ;;  %v544_v59 = vld [vmem:[#allocation2 + $0x79] sm:$0xff]  ;;  %s5043_s11 = scalar_lea.hbm %s5104_s5, %s2990_s27 }
  0x38   : > { %485 = vst.msk [vmem:[#allocation2 + $0x170] sm:$0xff] %vm437_vm0, %v435_v53  ;;  %484 = vst.msk [vmem:[#allocation2 + $0x168] sm:$0xff] %vm437_vm0, %v434_v56  ;;  %v545_v58 = vld [vmem:[#allocation2 + $0x81] sm:$0xff]  ;;  %v547_v60 = vld [vmem:[#allocation2 + $0x99] sm:$0xff] }
  0x39   : > { %842 = vrot.lane.b32.xlu1 %v543_v54, %s3385_s12  ;;  %v546_v61 = vld [vmem:[#allocation2 + $0x91] sm:$0xff]  ;;  %v548_v63 = vld [vmem:[#allocation2 + $0xa9] sm:$0xff]  ;;  %v550_v1 = vld [vmem:[#allocation2 + $0xc1] sm:$0xff] }
  0x3a   : > { %v549_v62 = vld [vmem:[#allocation2 + $0xb1] sm:$0xff]  ;;  %v551_v0 = vld [vmem:[#allocation2 + $0xc9] sm:$0xff]  ;;  %v3624_v2 = vld [vmem:[#allocation2 + $0xe1] sm:$0xff] }
  0x3b   : > { %840 = vrot.lane.b32.xlu0 %v542_v57, %s3385_s12  ;;  %v3626_v3 = vld [vmem:[#allocation2 + $0xd9] sm:$0xff]  ;;  %v3634_v5 = vld [vmem:[#allocation2 + $0xf1] sm:$0xff]  ;;  %v3642_v7 = vld [vmem:[#allocation2 + $0x109] sm:$0xff] }
  0x3c   : > { %v3632_v4 = vld [vmem:[#allocation2 + $0xf9] sm:$0xff]  ;;  %v3640_v6 = vld [vmem:[#allocation2 + $0x111] sm:$0xff]  ;;  %v3648_v8 = vld [vmem:[#allocation2 + $0x129] sm:$0xff] }
  0x3d   : > { %846 = vrot.lane.b32.xlu1 %v545_v58, %s3385_s12  ;;  %v3650_v9 = vld [vmem:[#allocation2 + $0x121] sm:$0xff]  ;;  %v560_v11 = vld [vmem:[#allocation2 + $0x139] sm:$0xff]  ;;  %v562_v13 = vld [vmem:[#allocation2 + $0x151] sm:$0xff] }
  0x3e   : > { %v561_v10 = vld [vmem:[#allocation2 + $0x141] sm:$0xff]  ;;  %v563_v12 = vld [vmem:[#allocation2 + $0x159] sm:$0xff]  ;;  %v567_v16 = vld [vmem:[#allocation2 + $0xa] sm:$0xff] }
  0x3f   : > { %844 = vrot.lane.b32.xlu0 %v544_v59, %s3385_s12  ;;  %v565_v14 = vld [vmem:[#allocation2 + $0x171] sm:$0xff]  ;;  %v564_v15 = vld [vmem:[#allocation2 + $0x169] sm:$0xff]  ;;  %v3666_v19 = vld [vmem:[#allocation2 + $0x1a] sm:$0xff] }
  0x40   : > { %v566_v17 = vld [vmem:[#allocation2 + $0x2] sm:$0xff]  ;;  %v3672_v20 = vld [vmem:[#allocation2 + $0x3a] sm:$0xff]  ;;  %v3674_v21 = vld [vmem:[#allocation2 + $0x32] sm:$0xff] }
  0x41   : > { %850 = vrot.lane.b32.xlu1 %v547_v60, %s3385_s12  ;;  %v3664_v18 = vld [vmem:[#allocation2 + $0x22] sm:$0xff]  ;;  %v3680_v22 = vld [vmem:[#allocation2 + $0x52] sm:$0xff]  ;;  %v3682_v23 = vld [vmem:[#allocation2 + $0x4a] sm:$0xff] }
  0x42   : > { %v3688_v25 = vld [vmem:[#allocation2 + $0x6a] sm:$0xff]  ;;  %v3690_v26 = vld [vmem:[#allocation2 + $0x62] sm:$0xff]  ;;  %v576_v29 = vld [vmem:[#allocation2 + $0x7a] sm:$0xff] }
  0x43   : > { %848 = vrot.lane.b32.xlu0 %v546_v61, %s3385_s12  ;;  %v577_v27 = vld [vmem:[#allocation2 + $0x82] sm:$0xff]  ;;  %v579_v30 = vld [vmem:[#allocation2 + $0x9a] sm:$0xff]  ;;  %v578_v31 = vld [vmem:[#allocation2 + $0x92] sm:$0xff] }
  0x44   : > { %v581_v32 = vld [vmem:[#allocation2 + $0xb2] sm:$0xff]  ;;  %v580_v33 = vld [vmem:[#allocation2 + $0xaa] sm:$0xff]  ;;  %v582_v37 = vld [vmem:[#allocation2 + $0xc2] sm:$0xff] }
  0x45   : > { %854 = vrot.lane.b32.xlu1 %v549_v62, %s3385_s12  ;;  %v583_v35 = vld [vmem:[#allocation2 + $0xca] sm:$0xff]  ;;  %v3704_v39 = vld [vmem:[#allocation2 + $0xe2] sm:$0xff]  ;;  %v3706_v40 = vld [vmem:[#allocation2 + $0xda] sm:$0xff] }
  0x46   : > { %v3712_v41 = vld [vmem:[#allocation2 + $0xfa] sm:$0xff]  ;;  %v3714_v42 = vld [vmem:[#allocation2 + $0xf2] sm:$0xff]  ;;  %v3722_v45 = vld [vmem:[#allocation2 + $0x10a] sm:$0xff] }
  0x47   : > { %852 = vrot.lane.b32.xlu0 %v548_v63, %s3385_s12  ;;  %v3720_v43 = vld [vmem:[#allocation2 + $0x112] sm:$0xff]  ;;  %v3728_v46 = vld [vmem:[#allocation2 + $0x12a] sm:$0xff]  ;;  %v3730_v47 = vld [vmem:[#allocation2 + $0x122] sm:$0xff] }
  0x48   : > { %v593_v48 = vld [vmem:[#allocation2 + $0x142] sm:$0xff]  ;;  %v3738_v50 = vld [vmem:[#allocation2 + $0x13a] sm:$0xff]  ;;  %v594_v54 = vld [vmem:[#allocation2 + $0x152] sm:$0xff] }
  0x49   : > { %858 = vrot.lane.b32.xlu1 %v551_v0, %s3385_s12  ;;  %v595_v52 = vld [vmem:[#allocation2 + $0x15a] sm:$0xff]  ;;  %v597_v56 = vld [vmem:[#allocation2 + $0x172] sm:$0xff]  ;;  %v596_v58 = vld [vmem:[#allocation2 + $0x16a] sm:$0xff] }
  0x4a   : > { %v3759_v61 = vld [vmem:[#allocation2 + $0x20] sm:$0xff]  ;;  %v3763_v63 = vld [vmem:[#allocation2 + $0x18] sm:$0xff] }
  0x4b   : > { %856 = vrot.lane.b32.xlu0 %v550_v1, %s3385_s12  ;;  %5115 = vst [vmem:[#allocation9_spill] sm:$0xff] %v3759_v61  ;;  %v3771_v1 = vld [vmem:[#allocation2 + $0x38] sm:$0xff] }
  0x4d   : > { %862 = vrot.lane.b32.xlu1 %v3624_v2, %s3385_s12 }
  0x4f   : > { %860 = vrot.lane.b32.xlu0 %v3626_v3, %s3385_s12 }
  0x51   : > { %866 = vrot.lane.b32.xlu1 %v3632_v4, %s3385_s12 }
  0x53   : > { %864 = vrot.lane.b32.xlu0 %v3634_v5, %s3385_s12 }
  0x55   : > { %870 = vrot.lane.b32.xlu1 %v3640_v6, %s3385_s12 }
  0x57   : > { %868 = vrot.lane.b32.xlu0 %v3642_v7, %s3385_s12 }
  0x59   : > { %874 = vrot.lane.b32.xlu1 %v3648_v8, %s3385_s12 }
  0x5b   : > { %872 = vrot.lane.b32.xlu0 %v3650_v9, %s3385_s12 }
  0x5d   : > { %878 = vrot.lane.b32.xlu1 %v561_v10, %s3385_s12 }
  0x5f   : > { %876 = vrot.lane.b32.xlu0 %v560_v11, %s3385_s12  ;;  %v3775_v11 = vld [vmem:[#allocation2 + $0x30] sm:$0xff] }
  0x61   : > { %882 = vrot.lane.b32.xlu1 %v563_v12, %s3385_s12 }
  0x63   : > { %880 = vrot.lane.b32.xlu0 %v562_v13, %s3385_s12  ;;  %v3783_v13 = vld [vmem:[#allocation2 + $0x50] sm:$0xff] }
  0x65   : > { %886 = vrot.lane.b32.xlu1 %v565_v14, %s3385_s12 }
  0x67   : > { %884 = vrot.lane.b32.xlu0 %v564_v15, %s3385_s12  ;;  %v3787_v15 = vld [vmem:[#allocation2 + $0x48] sm:$0xff] }
  0x69   : > { %954 = vrot.lane.b32.xlu1 %v567_v16, %s3386_s13 }
  0x6b   : > { %952 = vrot.lane.b32.xlu0 %v566_v17, %s3386_s13  ;;  %v3795_v17 = vld [vmem:[#allocation2 + $0x68] sm:$0xff] }
  0x6d   : > { %958 = vrot.lane.b32.xlu1 %v3664_v18, %s3386_s13 }
  0x6f   : > { %956 = vrot.lane.b32.xlu0 %v3666_v19, %s3386_s13 }
  0x71   : > { %962 = vrot.lane.b32.xlu1 %v3672_v20, %s3386_s13 }
  0x73   : > { %960 = vrot.lane.b32.xlu0 %v3674_v21, %s3386_s13 }
  0x75   : > { %966 = vrot.lane.b32.xlu1 %v3680_v22, %s3386_s13 }
  0x77   : > { %964 = vrot.lane.b32.xlu0 %v3682_v23, %s3386_s13 }
  0x79   : > { %970 = vrot.lane.b32.xlu1 %v3688_v25, %s3386_s13 }
  0x7b   : > { %968 = vrot.lane.b32.xlu0 %v3690_v26, %s3386_s13 }
  0x7d   : > { %974 = vrot.lane.b32.xlu1 %v577_v27, %s3386_s13 }
  0x7f   : > { %972 = vrot.lane.b32.xlu0 %v576_v29, %s3386_s13  ;;  %v3799_v29 = vld [vmem:[#allocation2 + $0x60] sm:$0xff] }
  0x81   : > { %978 = vrot.lane.b32.xlu1 %v579_v30, %s3386_s13 }
  0x83   : > { %976 = vrot.lane.b32.xlu0 %v578_v31, %s3386_s13  ;;  %v3807_v31 = vld [vmem:[#allocation2 + $0x80] sm:$0xff] }
  0x85   : > { %982 = vrot.lane.b32.xlu1 %v581_v32, %s3386_s13 }
  0x87   : > { %980 = vrot.lane.b32.xlu0 %v580_v33, %s3386_s13  ;;  %v3811_v33 = vld [vmem:[#allocation2 + $0x78] sm:$0xff] }
  0x89   : > { %986 = vrot.lane.b32.xlu1 %v583_v35, %s3386_s13 }
  0x8b   : > { %984 = vrot.lane.b32.xlu0 %v582_v37, %s3386_s13  ;;  %v3819_v37 = vld [vmem:[#allocation2 + $0x98] sm:$0xff] }
  0x8c   : > { %5123 = vst [vmem:[#allocation17_spill] sm:$0xff] %v3819_v37 }
  0x8d   : > { %990 = vrot.lane.b32.xlu1 %v3704_v39, %s3386_s13 }
  0x8f   : > { %988 = vrot.lane.b32.xlu0 %v3706_v40, %s3386_s13 }
  0x91   : > { %994 = vrot.lane.b32.xlu1 %v3712_v41, %s3386_s13 }
  0x93   : > { %992 = vrot.lane.b32.xlu0 %v3714_v42, %s3386_s13 }
  0x95   : > { %998 = vrot.lane.b32.xlu1 %v3720_v43, %s3386_s13 }
  0x97   : > { %996 = vrot.lane.b32.xlu0 %v3722_v45, %s3386_s13 }
  0x99   : > { %1002 = vrot.lane.b32.xlu1 %v3728_v46, %s3386_s13 }
  0x9b   : > { %1000 = vrot.lane.b32.xlu0 %v3730_v47, %s3386_s13  ;;  %v3736_v49 = vpop.permute.xlu1 %828 }
  0x9d   : > { %v3740_v51 = vpop.permute.xlu0 %824  ;;  %1006 = vrot.lane.b32.xlu1 %v593_v48, %s3386_s13 }
  0x9f   : > { %1004 = vrot.lane.b32.xlu0 %v3738_v50, %s3386_s13  ;;  %v3745_v53 = vpop.permute.xlu1 %830 }
  0xa0   : > { %5112 = vst [vmem:[#allocation6_spill] sm:$0xff] %v3745_v53 }
  0xa1   : > { %v3747_v55 = vpop.permute.xlu0 %826  ;;  %1010 = vrot.lane.b32.xlu1 %v595_v52, %s3386_s13  ;;  %v3823_v52 = vld [vmem:[#allocation2 + $0x90] sm:$0xff] }
  0xa3   : > { %1008 = vrot.lane.b32.xlu0 %v594_v54, %s3386_s13  ;;  %v3751_v57 = vpop.permute.xlu1 %834 }
  0xa4   : > { %5113 = vst [vmem:[#allocation7_spill] sm:$0xff] %v3751_v57  ;;  %v3859_v57 = vld [vmem:[#allocation2 + $0xd8] sm:$0xff] }
  0xa5   : > { %v3753_v59 = vpop.permute.xlu0 %832  ;;  %1014 = vrot.lane.b32.xlu1 %v597_v56, %s3386_s13  ;;  %v3831_v56 = vld [vmem:[#allocation2 + $0xb0] sm:$0xff]  ;;  %5129 = vst [vmem:[#allocation23_spill] sm:$0xff] %v3859_v57 }
  0xa7   : > { %1012 = vrot.lane.b32.xlu0 %v596_v58, %s3386_s13  ;;  %v3757_v60 = vpop.permute.xlu1 %838 }
  0xa8   : > { %5114 = vst [vmem:[#allocation8_spill] sm:$0xff] %v3757_v60  ;;  %v3855_v60 = vld [vmem:[#allocation2 + $0xe0] sm:$0xff] }
  0xa9   : > { %v3761_v62 = vpop.permute.xlu0 %836  ;;  %1082 = vrot.lane.b32.xlu1 %v3759_v61, %s3387_s14  ;;  %5127 = vst [vmem:[#allocation21_spill] sm:$0xff] %v3855_v60  ;;  %v3867_v61 = vld [vmem:[#allocation2 + $0xf8] sm:$0xff] }
  0xaa   : > { %5116 = vst [vmem:[#allocation10_spill] sm:$0xff] %v3761_v62 }
  0xab   : > { %1080 = vrot.lane.b32.xlu0 %v3763_v63, %s3387_s14  ;;  %v3769_v0 = vpop.permute.xlu1 %842 }
  0xac   : > { %5117 = vst [vmem:[#allocation11_spill] sm:$0xff] %v3769_v0  ;;  %v3847_v0 = vld [vmem:[#allocation2 + $0xc0] sm:$0xff] }
  0xad   : > { %v3773_v10 = vpop.permute.xlu0 %840  ;;  %1086 = vrot.lane.b32.xlu1 %v3771_v1, %s3387_s14 }
  0xae   : > { %5118 = vst [vmem:[#allocation12_spill] sm:$0xff] %v3773_v10 }
  0xaf   : > { %1084 = vrot.lane.b32.xlu0 %v3775_v11, %s3387_s14  ;;  %v3781_v12 = vpop.permute.xlu1 %846 }
  0xb0   : > { %5119 = vst [vmem:[#allocation13_spill] sm:$0xff] %v3781_v12  ;;  %v3843_v12 = vld [vmem:[#allocation2 + $0xc8] sm:$0xff] }
  0xb1   : > { %v3785_v14 = vpop.permute.xlu0 %844  ;;  %1090 = vrot.lane.b32.xlu1 %v3783_v13, %s3387_s14 }
  0xb2   : > { %5120 = vst [vmem:[#allocation14_spill] sm:$0xff] %v3785_v14 }
  0xb3   : > { %1088 = vrot.lane.b32.xlu0 %v3787_v15, %s3387_s14  ;;  %v3793_v16 = vpop.permute.xlu1 %850 }
  0xb4   : > { %5121 = vst [vmem:[#allocation15_spill] sm:$0xff] %v3793_v16  ;;  %v3835_v16 = vld [vmem:[#allocation2 + $0xa8] sm:$0xff] }
  0xb5   : > { %v3797_v27 = vpop.permute.xlu0 %848  ;;  %1094 = vrot.lane.b32.xlu1 %v3795_v17, %s3387_s14 }
  0xb6   : > { %5122 = vst [vmem:[#allocation16_spill] sm:$0xff] %v3797_v27 }
  0xb7   : > { %1092 = vrot.lane.b32.xlu0 %v3799_v29, %s3387_s14  ;;  %v3805_v30 = vpop.permute.xlu1 %854 }
  0xb9   : > { %v3809_v32 = vpop.permute.xlu0 %852  ;;  %1098 = vrot.lane.b32.xlu1 %v3807_v31, %s3387_s14 }
  0xbb   : > { %1096 = vrot.lane.b32.xlu0 %v3811_v33, %s3387_s14  ;;  %v3817_v35 = vpop.permute.xlu1 %858 }
  0xbd   : > { %v3821_v48 = vpop.permute.xlu0 %856  ;;  %1102 = vrot.lane.b32.xlu1 %v3819_v37, %s3387_s14  ;;  %v3893_v37 = vld [vmem:[#allocation2 + $0x120] sm:$0xff] }
  0xbf   : > { %1100 = vrot.lane.b32.xlu0 %v3823_v52, %s3387_s14  ;;  %v3829_v54 = vpop.permute.xlu1 %862 }
  0xc0   : > { %5124 = vst [vmem:[#allocation18_spill] sm:$0xff] %v3829_v54 }
  0xc1   : > { %v3833_v58 = vpop.permute.xlu0 %860  ;;  %1106 = vrot.lane.b32.xlu1 %v3831_v56, %s3387_s14 }
  0xc2   : > { %5125 = vst [vmem:[#allocation19_spill] sm:$0xff] %v3833_v58  ;;  %v3871_v58 = vld [vmem:[#allocation2 + $0xf0] sm:$0xff] }
  0xc3   : > { %1104 = vrot.lane.b32.xlu0 %v3835_v16, %s3387_s14  ;;  %v3841_v27 = vpop.permute.xlu1 %866 }
  0xc5   : > { %v3845_v14 = vpop.permute.xlu0 %864  ;;  %1110 = vrot.lane.b32.xlu1 %v3843_v12, %s3387_s14 }
  0xc7   : > { %1108 = vrot.lane.b32.xlu0 %v3847_v0, %s3387_s14  ;;  %v3853_v10 = vpop.permute.xlu1 %870 }
  0xc8   : > { %5126 = vst [vmem:[#allocation20_spill] sm:$0xff] %v3853_v10 }
  0xc9   : > { %v3857_v62 = vpop.permute.xlu0 %868  ;;  %1114 = vrot.lane.b32.xlu1 %v3855_v60, %s3387_s14 }
  0xca   : > { %5128 = vst [vmem:[#allocation22_spill] sm:$0xff] %v3857_v62  ;;  %v3879_v62 = vld [vmem:[#allocation2 + $0x110] sm:$0xff] }
  0xcb   : > { %1112 = vrot.lane.b32.xlu0 %v3859_v57, %s3387_s14  ;;  %v3865_v54 = vpop.permute.xlu1 %874  ;;  %v3883_v57 = vld [vmem:[#allocation2 + $0x108] sm:$0xff] }
  0xcc   : > { %5130 = vst [vmem:[#allocation24_spill] sm:$0xff] %v3865_v54 }
  0xcd   : > { %v3869_v53 = vpop.permute.xlu0 %872  ;;  %1118 = vrot.lane.b32.xlu1 %v3867_v61, %s3387_s14 }
  0xce   : > { %5131 = vst [vmem:[#allocation25_spill] sm:$0xff] %v3869_v53 }
  0xcf   : > { %1116 = vrot.lane.b32.xlu0 %v3871_v58, %s3387_s14  ;;  %v3877_v10 = vpop.permute.xlu1 %878 }
  0xd0   : > { %5132 = vst [vmem:[#allocation26_spill] sm:$0xff] %v3877_v10 }
  0xd1   : > { %v3881_v60 = vpop.permute.xlu0 %876  ;;  %1122 = vrot.lane.b32.xlu1 %v3879_v62, %s3387_s14 }
  0xd2   : > { %5133 = vst [vmem:[#allocation27_spill] sm:$0xff] %v3881_v60 }
  0xd3   : > { %1120 = vrot.lane.b32.xlu0 %v3883_v57, %s3387_s14  ;;  %v3889_v54 = vpop.permute.xlu1 %882 }
  0xd4   : > { %5134 = vst [vmem:[#allocation28_spill] sm:$0xff] %v3889_v54 }
  0xd5   : > { %v3891_v53 = vpop.permute.xlu0 %880  ;;  %1208 = vrot.lane.b32.xlu1 %v3537_v24, %s3388_s15 }
  0xd6   : > { %5135 = vst [vmem:[#allocation29_spill] sm:$0xff] %v3891_v53 }
  0xd7   : > { %1124 = vrot.lane.b32.xlu0 %v3893_v37, %s3387_s14  ;;  %v3899_v10 = vpop.permute.xlu1 %886 }
  0xd8   : > { %5136 = vst [vmem:[#allocation30_spill] sm:$0xff] %v3899_v10 }
  0xd9   : > { %v3901_v60 = vpop.permute.xlu0 %884  ;;  %1210 = vrot.lane.b32.xlu1 %v3549_v28, %s3388_s15 }
  0xda   : > { %5137 = vst [vmem:[#allocation31_spill] sm:$0xff] %v3901_v60 }
  0xdb   : > { %1240 = vrot.lane.b32.xlu0 %v3626_v3, %s3388_s15  ;;  %v3907_v54 = vpop.permute.xlu1 %954  ;;  %v1820_v3 = vsel %vm437_vm0, %v3775_v11, %v3753_v59 }
  0xdd   : > { %v3909_v53 = vpop.permute.xlu0 %952  ;;  %1336 = vrot.lane.b32.xlu1 %v3666_v19, %s3389_s16 }
  0xdf   : > { %1242 = vrot.lane.b32.xlu0 %v3624_v2, %s3388_s15  ;;  %v3915_v24 = vpop.permute.xlu1 %958 }
  0xe1   : > { %v3917_v10 = vpop.permute.xlu0 %956  ;;  %1338 = vrot.lane.b32.xlu1 %v3664_v18, %s3389_s16 }
  0xe3   : > { %1368 = vrot.lane.b32.xlu0 %v3706_v40, %s3389_s16  ;;  %v3923_v28 = vpop.permute.xlu1 %962 }
  0xe5   : > { %v961_v19 = vpop.permute.xlu0 %960  ;;  %1464 = vrot.lane.b32.xlu1 %v3775_v11, %s3390_s17  ;;  %v2080_v11 = vld [vmem:[%s5101_s2 + $0x8] sm:$0xff] }
  0xe6   : > { %v3929_v2 = vsel %vm1848_vm2, %v1820_v3, %v961_v19 }
  0xe7   : > { %1370 = vrot.lane.b32.xlu0 %v3704_v39, %s3389_s16  ;;  %v3935_v18 = vpop.permute.xlu1 %966  ;;  %v2079_v39 = vld [vmem:[%s5101_s2] sm:$0xff] }
  0xe8   : > { %5138 = vst [vmem:[#allocation32_spill] sm:$0xff] %v3935_v18  ;;  %v3086_v19 = vpack.c.bf16 %v2080_v11, %v2079_v39  ;;  %v2082_v18 = vld [vmem:[%s5101_s2 + $0x18] sm:$0xff] }
  0xe9   : > { %v3937_v40 = vpop.permute.xlu0 %964  ;;  %1466 = vrot.lane.b32.xlu1 %v3771_v1, %s3390_s17 }
  0xea   : > { %3087 = vmatprep.subr.bf16.mxu0 %v3086_v19  ;;  %3094 = vmatprep.subr.bf16.mxu1 %v3086_v19 }
  0xeb   : > { %1496 = vrot.lane.b32.xlu0 %v3871_v58, %s3390_s17  ;;  %v3943_v59 = vpop.permute.xlu1 %970  ;;  %3089 = vmatpush3.bf16.msra.mxu0 %v3086_v19 }
  0xec   : > { %5139 = vst [vmem:[#allocation33_spill] sm:$0xff] %v3943_v59  ;;  %3097 = vmatpush3.bf16.msra.mxu1 %v3086_v19  ;;  %v1830_v19 = vsel %vm437_vm0, %v3835_v16, %v3809_v32 }
  0xed   : > { %v3945_v3 = vpop.permute.xlu0 %968  ;;  %1592 = vrot.lane.b32.xlu1 %v3565_v36, %s3391_s24 }
  0xee   : > { %5140 = vst [vmem:[#allocation34_spill] sm:$0xff] %v3945_v3  ;;  %v2081_v3 = vld [vmem:[%s5101_s2 + $0x10] sm:$0xff] }
  0xef   : > { %1498 = vrot.lane.b32.xlu0 %v3867_v61, %s3390_s17  ;;  %v3957_v60 = vpop.permute.xlu1 %974  ;;  %v3090_v39 = vpack.c.bf16 %v2082_v18, %v2081_v3  ;;  %v1831_v18 = vsel %vm437_vm0, %v3831_v56, %v3805_v30 }
  0xf0   : > { %5141 = vst [vmem:[#allocation35_spill] sm:$0xff] %v3957_v60 }
  0xf1   : > { %v3959_v59 = vpop.permute.xlu0 %972  ;;  %1212 = vrot.lane.b32.xlu1 %v3565_v36, %s3388_s15  ;;  %3091 = vmatprep.subr.bf16.mxu0 %v3090_v39  ;;  %v2083_v36 = vld [vmem:[%s5101_s2 + $0x20] sm:$0xf] }
  0xf2   : > { %5142 = vst [vmem:[#allocation36_spill] sm:$0xff] %v3959_v59  ;;  %3095 = vmatprep.subr.bf16.mxu1 %v3090_v39  ;;  %3093 = vmatpush3.bf16.msra.mxu0 %v3090_v39 }
  0xf3   : > { %1624 = vrot.lane.b32.xlu0 %v3634_v5, %s3391_s24  ;;  %v3971_v11 = vpop.permute.xlu1 %978  ;;  %3098 = vmatpush3.bf16.msra.mxu1 %v3090_v39  ;;  %v1837_v39 = vsel %vm437_vm0, %v3867_v61, %v3841_v27 }
  0xf4   : > { %5143 = vst [vmem:[#allocation37_spill] sm:$0xff] %v3971_v11  ;;  %3036 = vmatprep.subr.msk.mxu0 %vm2181_vm3, %v2083_v36  ;;  %3096 = vmatprep.subr.msk.mxu1 %vm2181_vm3, %v2083_v36 }
  0xf5   : > { %v3973_v60 = vpop.permute.xlu0 %976  ;;  %1594 = vrot.lane.b32.xlu1 %v3561_v34, %s3391_s24 }
  0xf6   : > { %5144 = vst [vmem:[#allocation38_spill] sm:$0xff] %v3973_v60  ;;  %3037 = vmatpush3.msk.msra.mxu0 %vm2181_vm3, %v2083_v36 }
  0xf7   : > { %1244 = vrot.lane.b32.xlu0 %v3634_v5, %s3388_s15  ;;  %v983_v3 = vpop.permute.xlu1 %982  ;;  %3099 = vmatpush3.msk.msra.mxu1 %vm2181_vm3, %v2083_v36 }
  0xf8   : > { %v3989_v11 = vsel %vm1848_vm2, %v1831_v18, %v983_v3 }
  0xf9   : > { %5145 = vst [vmem:[#allocation39_spill] sm:$0xff] %v3989_v11  ;;  %v981_v5 = vpop.permute.xlu0 %980  ;;  %1720 = vrot.lane.b32.xlu1 %v3674_v21, %s3392_s9 }
  0xfa   : > { %v3992_v60 = vsel %vm1848_vm2, %v1830_v19, %v981_v5 }
  0xfb   : > { %5146 = vst [vmem:[#allocation40_spill] sm:$0xff] %v3992_v60  ;;  %1626 = vrot.lane.b32.xlu0 %v3632_v4, %s3391_s24  ;;  %v3998_v30 = vpop.permute.xlu1 %986 }
  0xfd   : > { %v4000_v56 = vpop.permute.xlu0 %984  ;;  %1214 = vrot.lane.b32.xlu1 %v3561_v34, %s3388_s15  ;;  %v1836_v34 = vsel %vm437_vm0, %v3871_v58, %v3845_v14 }
  0xff   : > { %1752 = vrot.lane.b32.xlu0 %v3714_v42, %s3392_s9  ;;  %v4006_v16 = vpop.permute.xlu1 %990 }
 0x101   : > { %v4008_v32 = vpop.permute.xlu0 %988  ;;  %1340 = vrot.lane.b32.xlu1 %v3674_v21, %s3389_s16 }
 0x103   : > { %1246 = vrot.lane.b32.xlu0 %v3632_v4, %s3388_s15  ;;  %v995_v36 = vpop.permute.xlu1 %994 }
 0x104   : > { %v4021_v18 = vsel %vm1848_vm2, %v1837_v39, %v995_v36 }
 0x105   : > { %v993_v3 = vpop.permute.xlu0 %992  ;;  %1722 = vrot.lane.b32.xlu1 %v3672_v20, %s3392_s9 }
 0x106   : > { %v4024_v19 = vsel %vm1848_vm2, %v1836_v34, %v993_v3 }
 0x107   : > { %1372 = vrot.lane.b32.xlu0 %v3714_v42, %s3389_s16  ;;  %v4030_v4 = vpop.permute.xlu1 %998 }
 0x108   : > { %5147 = vst [vmem:[#allocation41_spill] sm:$0xff] %v4030_v4  ;;  %v4228_v4 = vld [vmem:[#allocation2 + $0x140] sm:$0xff] }
 0x109   : > { %v4032_v21 = vpop.permute.xlu0 %996  ;;  %1342 = vrot.lane.b32.xlu1 %v3672_v20, %s3389_s16 }
 0x10b   : > { %1754 = vrot.lane.b32.xlu0 %v3712_v41, %s3392_s9  ;;  %v4038_v61 = vpop.permute.xlu1 %1002 }
 0x10c   : > { %5148 = vst [vmem:[#allocation42_spill] sm:$0xff] %v4038_v61 }
 0x10d   : > { %v4040_v14 = vpop.permute.xlu0 %1000  ;;  %1468 = vrot.lane.b32.xlu1 %v3787_v15, %s3390_s17 }
 0x10e   : > { %5149 = vst [vmem:[#allocation43_spill] sm:$0xff] %v4040_v14 }
 0x10f   : > { %1374 = vrot.lane.b32.xlu0 %v3712_v41, %s3389_s16  ;;  %v4046_v42 = vpop.permute.xlu1 %1006 }
 0x110   : > { %5150 = vst [vmem:[#allocation44_spill] sm:$0xff] %v4046_v42 }
 0x111   : > { %v4048_v27 = vpop.permute.xlu0 %1004  ;;  %1470 = vrot.lane.b32.xlu1 %v3783_v13, %s3390_s17 }
 0x112   : > { %5151 = vst [vmem:[#allocation45_spill] sm:$0xff] %v4048_v27 }
 0x113   : > { %1500 = vrot.lane.b32.xlu0 %v3883_v57, %s3390_s17  ;;  %v4054_v20 = vpop.permute.xlu1 %1010 }
 0x114   : > { %5152 = vst [vmem:[#allocation46_spill] sm:$0xff] %v4054_v20  ;;  %v4138_v20 = vld [vmem:[#allocation2 + $0x128] sm:$0xff] }
 0x115   : > { %v4056_v58 = vpop.permute.xlu0 %1008  ;;  %1596 = vrot.lane.b32.xlu1 %v3583_v44, %s3391_s24  ;;  %5165 = vst [vmem:[#allocation59_spill] sm:$0xff] %v4138_v20 }
 0x116   : > { %5153 = vst [vmem:[#allocation47_spill] sm:$0xff] %v4056_v58 }
 0x117   : > { %1502 = vrot.lane.b32.xlu0 %v3879_v62, %s3390_s17  ;;  %v4062_v41 = vpop.permute.xlu1 %1014 }
 0x118   : > { %5154 = vst [vmem:[#allocation48_spill] sm:$0xff] %v4062_v41 }
 0x119   : > { %v4064_v15 = vpop.permute.xlu0 %1012  ;;  %1216 = vrot.lane.b32.xlu1 %v3583_v44, %s3388_s15 }
 0x11a   : > { %5155 = vst [vmem:[#allocation49_spill] sm:$0xff] %v4064_v15 }
 0x11b   : > { %1628 = vrot.lane.b32.xlu0 %v3642_v7, %s3391_s24  ;;  %v4070_v13 = vpop.permute.xlu1 %1082 }
 0x11d   : > { %v4072_v5 = vpop.permute.xlu0 %1080  ;;  %1598 = vrot.lane.b32.xlu1 %v3569_v38, %s3391_s24 }
 0x11f   : > { %1248 = vrot.lane.b32.xlu0 %v3642_v7, %s3388_s15  ;;  %v4078_v62 = vpop.permute.xlu1 %1086 }
 0x121   : > { %v4080_v39 = vpop.permute.xlu0 %1084  ;;  %1724 = vrot.lane.b32.xlu1 %v3682_v23, %s3392_s9 }
 0x123   : > { %1630 = vrot.lane.b32.xlu0 %v3640_v6, %s3391_s24  ;;  %v4086_v44 = vpop.permute.xlu1 %1090 }
 0x125   : > { %v4088_v36 = vpop.permute.xlu0 %1088  ;;  %1218 = vrot.lane.b32.xlu1 %v3569_v38, %s3388_s15 }
 0x127   : > { %1756 = vrot.lane.b32.xlu0 %v3722_v45, %s3392_s9  ;;  %v4094_v7 = vpop.permute.xlu1 %1094 }
 0x128   : > { %5156 = vst [vmem:[#allocation50_spill] sm:$0xff] %v4094_v7 }
 0x129   : > { %v4096_v34 = vpop.permute.xlu0 %1092  ;;  %1344 = vrot.lane.b32.xlu1 %v3682_v23, %s3389_s16 }
 0x12b   : > { %1250 = vrot.lane.b32.xlu0 %v3640_v6, %s3388_s15  ;;  %v4102_v3 = vpop.permute.xlu1 %1098 }
 0x12c   : > { %5157 = vst [vmem:[#allocation51_spill] sm:$0xff] %v4102_v3  ;;  %v4203_v3 = vld [vmem:[#allocation2 + $0x138] sm:$0xff] }
 0x12d   : > { %v4104_v11 = vpop.permute.xlu0 %1096  ;;  %1726 = vrot.lane.b32.xlu1 %v3680_v22, %s3392_s9 }
 0x12e   : > { %5158 = vst [vmem:[#allocation52_spill] sm:$0xff] %v4104_v11 }
 0x12f   : > { %1376 = vrot.lane.b32.xlu0 %v3722_v45, %s3389_s16  ;;  %v4110_v38 = vpop.permute.xlu1 %1102 }
 0x130   : > { %5159 = vst [vmem:[#allocation53_spill] sm:$0xff] %v4110_v38 }
 0x131   : > { %v4112_v41 = vpop.permute.xlu0 %1100  ;;  %1346 = vrot.lane.b32.xlu1 %v3680_v22, %s3389_s16  ;;  %v732_v22 = vld [vmem:[#allocation2 + $0x61] sm:$0xff] }
 0x132   : > { %5160 = vst [vmem:[#allocation54_spill] sm:$0xff] %v4112_v41 }
 0x133   : > { %1758 = vrot.lane.b32.xlu0 %v3720_v43, %s3392_s9  ;;  %v4118_v6 = vpop.permute.xlu1 %1106 }
 0x134   : > { %5161 = vst [vmem:[#allocation55_spill] sm:$0xff] %v4118_v6 }
 0x135   : > { %v4120_v23 = vpop.permute.xlu0 %1104  ;;  %1472 = vrot.lane.b32.xlu1 %v3799_v29, %s3390_s17 }
 0x136   : > { %5162 = vst [vmem:[#allocation56_spill] sm:$0xff] %v4120_v23 }
 0x137   : > { %1378 = vrot.lane.b32.xlu0 %v3720_v43, %s3389_s16  ;;  %v4126_v45 = vpop.permute.xlu1 %1110 }
 0x138   : > { %5163 = vst [vmem:[#allocation57_spill] sm:$0xff] %v4126_v45 }
 0x139   : > { %v4128_v60 = vpop.permute.xlu0 %1108  ;;  %1474 = vrot.lane.b32.xlu1 %v3795_v17, %s3390_s17 }
 0x13a   : > { %5164 = vst [vmem:[#allocation58_spill] sm:$0xff] %v4128_v60  ;;  %v733_v60 = vld [vmem:[#allocation2 + $0x69] sm:$0xff] }
 0x13b   : > { %1504 = vrot.lane.b32.xlu0 %v3893_v37, %s3390_s17  ;;  %v4134_v15 = vpop.permute.xlu1 %1114 }
 0x13d   : > { %v4136_v6 = vpop.permute.xlu0 %1112  ;;  %1600 = vrot.lane.b32.xlu1 %v732_v22, %s3391_s24 }
 0x13f   : > { %1506 = vrot.lane.b32.xlu0 %v4138_v20, %s3390_s17  ;;  %v4143_v43 = vpop.permute.xlu1 %1118 }
 0x141   : > { %v4145_v29 = vpop.permute.xlu0 %1116  ;;  %1126 = vrot.lane.b32.xlu1 %v4138_v20, %s3387_s14  ;;  %v502_v20 = vld [vmem:[#allocation2] sm:$0xff] }
 0x143   : > { %1632 = vrot.lane.b32.xlu0 %v3650_v9, %s3391_s24  ;;  %v4151_v17 = vpop.permute.xlu1 %1122 }
 0x145   : > { %v4153_v37 = vpop.permute.xlu0 %1120  ;;  %1252 = vrot.lane.b32.xlu1 %v3650_v9, %s3388_s15 }
 0x147   : > { %1220 = vrot.lane.b32.xlu0 %v732_v22, %s3388_s15  ;;  %v1209_v45 = vpop.permute.xlu1 %1208 }
 0x149   : > { %v4158_v23 = vpop.permute.xlu0 %1124  ;;  %1634 = vrot.lane.b32.xlu1 %v3648_v8, %s3391_s24 }
 0x14b   : > { %1602 = vrot.lane.b32.xlu0 %v733_v60, %s3391_s24  ;;  %v4163_v58 = vpop.permute.xlu1 %1210 }
 0x14d   : > { %v4165_v38 = vpop.permute.xlu0 %1240  ;;  %1760 = vrot.lane.b32.xlu1 %v3730_v47, %s3392_s9 }
 0x14f   : > { %1728 = vrot.lane.b32.xlu0 %v3690_v26, %s3392_s9  ;;  %v1337_v9 = vpop.permute.xlu1 %1336 }
 0x151   : > { %v4171_v22 = vpop.permute.xlu0 %1242  ;;  %1254 = vrot.lane.b32.xlu1 %v3648_v8, %s3388_s15 }
 0x153   : > { %1222 = vrot.lane.b32.xlu0 %v733_v60, %s3388_s15  ;;  %v4176_v42 = vpop.permute.xlu1 %1338 }
 0x155   : > { %v1369_v41 = vpop.permute.xlu0 %1368  ;;  %1380 = vrot.lane.b32.xlu1 %v3730_v47, %s3389_s16 }
 0x157   : > { %1348 = vrot.lane.b32.xlu0 %v3690_v26, %s3389_s16  ;;  %v1465_v59 = vpop.permute.xlu1 %1464  ;;  %v487_v26 = vld [vmem:[%s4195_s25] sm:$0xff] }
 0x158   : > { %494 = vst.msk [vmem:[#allocation2 + $0x180] sm:$0xff] %vm437_vm0, %v487_v26  ;;  %v488_v26 = vld [vmem:[%s4195_s25 + $0x8] sm:$0xff] }
 0x159   : > { %v4182_v27 = vpop.permute.xlu0 %1370  ;;  %1762 = vrot.lane.b32.xlu1 %v3728_v46, %s3392_s9  ;;  %495 = vst.msk [vmem:[#allocation2 + $0x188] sm:$0xff] %vm437_vm0, %v488_v26 }
 0x15b   : > { %1730 = vrot.lane.b32.xlu0 %v3688_v25, %s3392_s9  ;;  %v4188_v8 = vpop.permute.xlu1 %1466 }
 0x15d   : > { %v1497_v60 = vpop.permute.xlu0 %1496  ;;  %1382 = vrot.lane.b32.xlu1 %v3728_v46, %s3389_s16 }
 0x15f   : > { %1350 = vrot.lane.b32.xlu0 %v3688_v25, %s3389_s16  ;;  %v1593_v47 = vpop.permute.xlu1 %1592  ;;  %v1816_v25 = vsel %vm437_vm0, %v502_v20, %v3740_v51 }
 0x160   : > { %v1849_v14 = vsel %vm1848_vm2, %v1816_v25, %v3909_v53  ;;  %v1832_v25 = vsel %vm437_vm0, %v3847_v0, %v3821_v48 }
 0x161   : > { %v4205_v61 = vpop.permute.xlu0 %1498  ;;  %1508 = vrot.lane.b32.xlu1 %v4203_v3, %s3390_s17  ;;  %v1882_v7 = vsel %vm1881_vm4, %v1849_v14, %v4072_v5  ;;  %v1865_v5 = vsel %vm1848_vm2, %v1832_v25, %v4000_v56 }
 0x162   : > { %v1915_v20 = vsel %vm1914_vm5, %v1882_v7, %v1209_v45  ;;  %v1898_v26 = vsel %vm1881_vm4, %v1865_v5, %v4136_v6  ;;  %v489_v5 = vld [vmem:[%s4195_s25 + $0x10] sm:$0x3] }
 0x163   : > { %1476 = vrot.lane.b32.xlu0 %v3811_v33, %s3390_s17  ;;  %v4211_v46 = vpop.permute.xlu1 %1212  ;;  %v734_v33 = vld [vmem:[#allocation2 + $0x79] sm:$0xff]  ;;  %v1948_v53 = vsel %vm1947_vm6, %v1915_v20, %v1337_v9  ;;  %v1931_v48 = vsel %vm1914_vm5, %v1898_v26, %v4165_v38  ;;  %496 = vst.msk [vmem:[#allocation2 + $0x190] sm:$0x3] %vm440_vm1, %v489_v5 }
 0x164   : > { %v1981_v14 = vsel %vm1980_vm7, %v1948_v53, %v1465_v59  ;;  %v750_v9 = vld [vmem:[#allocation2 + $0x139] sm:$0xff]  ;;  %v503_v59 = vld [vmem:[#allocation2 + $0x8] sm:$0xff]  ;;  %v1964_v56 = vsel %vm1947_vm6, %v1931_v48, %v1369_v41 }
 0x165   : > { %v1625_v11 = vpop.permute.xlu0 %1624  ;;  %1478 = vrot.lane.b32.xlu1 %v3807_v31, %s3390_s17  ;;  %v2014_v7 = vsel %vm2013_vm8, %v1981_v14, %v1593_v47  ;;  %v1997_v47 = vsel %vm1980_vm7, %v1964_v56, %v1497_v60  ;;  %v1817_v38 = vsel %vm437_vm0, %v503_v59, %v3747_v55  ;;  %v751_v60 = vld [vmem:[#allocation2 + $0x141] sm:$0xff]  ;;  %v490_v5 = vld [vmem:[%s4195_s25 + $0x18] sm:$0xff] }
 0x166   : > { %v2030_v53 = vsel %vm2013_vm8, %v1997_v47, %v1625_v11  ;;  %v1850_v41 = vsel %vm1848_vm2, %v1817_v38, %v3907_v54  ;;  %v735_v55 = vld [vmem:[#allocation2 + $0x81] sm:$0xff]  ;;  %497 = vst.msk [vmem:[#allocation2 + $0x198] sm:$0xff] %vm437_vm0, %v490_v5 }
 0x167   : > { %1128 = vrot.lane.b32.xlu0 %v4203_v3, %s3387_s14  ;;  %v1595_v51 = vpop.permute.xlu1 %1594  ;;  %v1883_v11 = vsel %vm1881_vm4, %v1850_v41, %v4070_v13  ;;  %v766_v48 = vld [vmem:[#allocation2 + $0x7a] sm:$0xff] }
 0x169   : > { %v4226_v31 = vpop.permute.xlu0 %1244  ;;  %1604 = vrot.lane.b32.xlu1 %v734_v33, %s3391_s24 }
 0x16b   : > { %1510 = vrot.lane.b32.xlu0 %v4228_v4, %s3390_s17  ;;  %v1721_v45 = vpop.permute.xlu1 %1720 }
 0x16c   : > { %v2047_v0 = vsel %vm2046_vm9, %v2014_v7, %v1721_v45  ;;  %v1916_v45 = vsel %vm1914_vm5, %v1883_v11, %v4163_v58 }
 0x16d   : > { %v1627_v20 = vpop.permute.xlu0 %1626  ;;  %1130 = vrot.lane.b32.xlu1 %v4228_v4, %s3387_s14  ;;  %3038 = vmatprep.mubr.msk.f32.mxu0 %vm2084_vm10, %v2047_v0  ;;  %v1949_v54 = vsel %vm1947_vm6, %v1916_v45, %v4176_v42  ;;  %v491_v45 = vld [vmem:[%s4195_s25 + $0x20] sm:$0xff] }
 0x16e   : > { %v1982_v26 = vsel %vm1980_vm7, %v1949_v54, %v4188_v8  ;;  %498 = vst.msk [vmem:[#allocation2 + $0x1a0] sm:$0xff] %vm437_vm0, %v491_v45 }
 0x16f   : > { %1636 = vrot.lane.b32.xlu0 %v750_v9, %s3391_s24  ;;  %v4252_v6 = vpop.permute.xlu1 %1214  ;;  %v2015_v58 = vsel %vm2013_vm8, %v1982_v26, %v1595_v51 }
 0x171   : > { %v1753_v25 = vpop.permute.xlu0 %1752  ;;  %1256 = vrot.lane.b32.xlu1 %v750_v9, %s3388_s15 }
 0x172   : > { %v2063_v14 = vsel %vm2046_vm9, %v2030_v53, %v1753_v25  ;;  %v767_v53 = vld [vmem:[#allocation2 + $0x82] sm:$0xff] }
 0x173   : > { %1224 = vrot.lane.b32.xlu0 %v734_v33, %s3388_s15  ;;  %3062 = vmatprep.mubr.msk.f32.mxu1 %vm2084_vm10, %v2063_v14  ;;  %v1341_v7 = vpop.permute.xlu1 %1340  ;;  %v1833_v33 = vsel %vm437_vm0, %v3843_v12, %v3817_v35 }
 0x174   : > { %v1866_v13 = vsel %vm1848_vm2, %v1833_v33, %v3998_v30 }
 0x175   : > { %v4269_v9 = vpop.permute.xlu0 %1246  ;;  %1638 = vrot.lane.b32.xlu1 %v751_v60, %s3391_s24  ;;  %v1899_v42 = vsel %vm1881_vm4, %v1866_v13, %v4134_v15 }
 0x176   : > { %v1932_v12 = vsel %vm1914_vm5, %v1899_v42, %v4171_v22 }
 0x177   : > { %1606 = vrot.lane.b32.xlu0 %v735_v55, %s3391_s24  ;;  %v1723_v0 = vpop.permute.xlu1 %1722  ;;  %v1965_v35 = vsel %vm1947_vm6, %v1932_v12, %v4182_v27 }
 0x178   : > { %v2048_v59 = vsel %vm2046_vm9, %v2015_v58, %v1723_v0  ;;  %v1998_v30 = vsel %vm1980_vm7, %v1965_v35, %v4205_v61  ;;  %v783_v61 = vld [vmem:[#allocation2 + $0x142] sm:$0xff]  ;;  %v5168_v0 = vld [vmem:[#allocation23_spill] sm:$0xff] }
 0x179   : > { %v1373_v56 = vpop.permute.xlu0 %1372  ;;  %1764 = vrot.lane.b32.xlu1 %v3738_v50, %s3392_s9  ;;  %3039 = vmatmul.mubr.msk.f32.vlgmr.msra.gmra.mrb[0].mxu0 %vm2084_vm10, %v2048_v59  ;;  %v2031_v8 = vsel %vm2013_vm8, %v1998_v30, %v1627_v20  ;;  %v687_v50 = vld [vmem:[#allocation2 + $0x13a] sm:$0xff]  ;;  %v5166_v58 = vld [vmem:[#allocation17_spill] sm:$0xff] }
 0x17a   : > { %v4353_v30 = vld [vmem:[#allocation2 + $0x158] sm:$0xff] }
 0x17b   : > { %1732 = vrot.lane.b32.xlu0 %v766_v48, %s3392_s9  ;;  %v4296_v15 = vpop.permute.xlu1 %1342 }
 0x17d   : > { %v1755_v51 = vpop.permute.xlu0 %1754  ;;  %1258 = vrot.lane.b32.xlu1 %v751_v60, %s3388_s15  ;;  %v4319_v60 = vld [vmem:[#allocation2 + $0x150] sm:$0xff] }
 0x17e   : > { %v2064_v22 = vsel %vm2046_vm9, %v2031_v8, %v1755_v51  ;;  %v492_v51 = vld [vmem:[%s4195_s25 + $0x28] sm:$0x3]  ;;  %s3393_s25 = smov [#allocation3]  }
 0x17f   : > { %1226 = vrot.lane.b32.xlu0 %v735_v55, %s3388_s15  ;;  %3063 = vmatmul.mubr.msk.f32.vlgmr.msra.gmra.mrb[0].mxu1 %vm2084_vm10, %v2064_v22  ;;  %v1469_v27 = vpop.permute.xlu1 %1468  ;;  %v1818_v55 = vsel %vm437_vm0, %v3763_v63, %v3736_v49  ;;  %499 = vst.msk [vmem:[#allocation2 + $0x1a8] sm:$0x3] %vm440_vm1, %v492_v51  ;;  %v769_v51 = vld [vmem:[#allocation2 + $0x9a] sm:$0xff]  ;;  %s3309_s7 = sshll.u32 %s3393_s25, 4  ;;  %s3310_s7 = int_to_ptr.vmem [resolvable:$false] %s3309_s7 }
 0x180   : > { %v1851_v54 = vsel %vm1848_vm2, %v1818_v55, %v3917_v10  ;;  %v5167_v10 = vld [vmem:[#allocation19_spill] sm:$0xff]  ;;  %s3311_s8 = scalar_lea.vmem %s3310_s7, 8192 }
 0x181   : > { %v4303_v47 = vpop.permute.xlu0 %1374  ;;  %1384 = vrot.lane.b32.xlu1 %v687_v50, %s3389_s16  ;;  %v1884_v33 = vsel %vm1881_vm4, %v1851_v54, %v4080_v39  ;;  %v736_v39 = vld [vmem:[#allocation2 + $0x91] sm:$0xff] }
 0x182   : > { %v1917_v13 = vsel %vm1914_vm5, %v1884_v33, %v4211_v46  ;;  %v752_v50 = vld [vmem:[#allocation2 + $0x151] sm:$0xff]  ;;  %v5172_v33 = vld [vmem:[#allocation21_spill] sm:$0xff] }
 0x183   : > { %1352 = vrot.lane.b32.xlu0 %v766_v48, %s3389_s16  ;;  %v4307_v20 = vpop.permute.xlu1 %1470  ;;  %v1950_v63 = vsel %vm1947_vm6, %v1917_v13, %v1341_v7 }
 0x184   : > { %v1983_v48 = vsel %vm1980_vm7, %v1950_v63, %v1469_v27 }
 0x185   : > { %v1501_v25 = vpop.permute.xlu0 %1500  ;;  %1766 = vrot.lane.b32.xlu1 %v783_v61, %s3392_s9 }
 0x187   : > { %1734 = vrot.lane.b32.xlu0 %v767_v53, %s3392_s9  ;;  %v1597_v38 = vpop.permute.xlu1 %1596 }
 0x188   : > { %v2016_v42 = vsel %vm2013_vm8, %v1983_v48, %v1597_v38 }
 0x189   : > { %v4311_v14 = vpop.permute.xlu0 %1502  ;;  %1386 = vrot.lane.b32.xlu1 %v783_v61, %s3389_s16  ;;  %v5169_v61 = vld [vmem:[#allocation6_spill] sm:$0xff] }
 0x18b   : > { %1354 = vrot.lane.b32.xlu0 %v767_v53, %s3389_s16  ;;  %v4317_v41 = vpop.permute.xlu1 %1216  ;;  %v5170_v53 = vld [vmem:[#allocation9_spill] sm:$0xff] }
 0x18c   : > { %v1819_v38 = vsel %vm437_vm0, %v5170_v53, %v5169_v61  ;;  %v4433_v61 = vld [vmem:[#allocation2 + $0x168] sm:$0xff] }
 0x18d   : > { %v1629_v11 = vpop.permute.xlu0 %1628  ;;  %1512 = vrot.lane.b32.xlu1 %v4319_v60, %s3390_s17 }
 0x18f   : > { %1480 = vrot.lane.b32.xlu0 %v3823_v52, %s3390_s17  ;;  %v1599_v26 = vpop.permute.xlu1 %1598  ;;  %v1834_v52 = vsel %vm437_vm0, %v5168_v0, %v5167_v10  ;;  %v737_v0 = vld [vmem:[#allocation2 + $0x99] sm:$0xff] }
 0x190   : > { %v1867_v46 = vsel %vm1848_vm2, %v1834_v52, %v4008_v32 }
 0x191   : > { %v4336_v49 = vpop.permute.xlu0 %1248  ;;  %1482 = vrot.lane.b32.xlu1 %v5166_v58, %s3390_s17  ;;  %v1900_v59 = vsel %vm1881_vm4, %v1867_v46, %v4145_v29 }
 0x192   : > { %v1933_v8 = vsel %vm1914_vm5, %v1900_v59, %v4226_v31 }
 0x193   : > { %1132 = vrot.lane.b32.xlu0 %v4319_v60, %s3387_s14  ;;  %v1725_v7 = vpop.permute.xlu1 %1724  ;;  %v1966_v32 = vsel %vm1947_vm6, %v1933_v8, %v1373_v56  ;;  %v1852_v56 = vsel %vm1848_vm2, %v1819_v38, %v3915_v24  ;;  %v5171_v24 = vld [vmem:[#allocation18_spill] sm:$0xff] }
 0x194   : > { %v2049_v12 = vsel %vm2046_vm9, %v2016_v42, %v1725_v7  ;;  %v1999_v29 = vsel %vm1980_vm7, %v1966_v32, %v1501_v25  ;;  %v1885_v25 = vsel %vm1881_vm4, %v1852_v56, %v4078_v62  ;;  %v1835_v13 = vsel %vm437_vm0, %v5172_v33, %v5171_v24  ;;  %v753_v62 = vld [vmem:[#allocation2 + $0x159] sm:$0xff]  ;;  %v707_v38 = vld [vmem:[#allocation2 + $0xb0] sm:$0xff] }
 0x195   : > { %v1631_v35 = vpop.permute.xlu0 %1630  ;;  %1608 = vrot.lane.b32.xlu1 %v736_v39, %s3391_s24  ;;  %3041 = vmatprep.mubr.msk.f32.mxu0 %vm2084_vm10, %v2049_v12  ;;  %v2032_v27 = vsel %vm2013_vm8, %v1999_v29, %v1629_v11  ;;  %v1918_v55 = vsel %vm1914_vm5, %v1885_v25, %v4252_v6  ;;  %v1868_v6 = vsel %vm1848_vm2, %v1835_v13, %v4006_v16 }
 0x196   : > { %v1951_v54 = vsel %vm1947_vm6, %v1918_v55, %v4296_v15  ;;  %v1901_v15 = vsel %vm1881_vm4, %v1868_v6, %v4143_v43  ;;  %v1886_v25 = vsel %vm1881_vm4, %v3929_v2, %v4088_v36  ;;  %v738_v2 = vld [vmem:[#allocation2 + $0xa9] sm:$0xff] }
 0x197   : > { %1514 = vrot.lane.b32.xlu0 %v4353_v30, %s3390_s17  ;;  %v4365_v22 = vpop.permute.xlu1 %1218  ;;  %v1984_v63 = vsel %vm1980_vm7, %v1951_v54, %v4307_v20  ;;  %v1934_v46 = vsel %vm1914_vm5, %v1901_v15, %v4269_v9  ;;  %v784_v20 = vld [vmem:[#allocation2 + $0x152] sm:$0xff]  ;;  %v1919_v24 = vsel %vm1914_vm5, %v1886_v25, %v4317_v41 }
 0x198   : > { %v2017_v58 = vsel %vm2013_vm8, %v1984_v63, %v1599_v26  ;;  %v1967_v16 = vsel %vm1947_vm6, %v1934_v46, %v4303_v47  ;;  %v4461_v6 = vld [vmem:[#allocation2 + $0x170] sm:$0xff] }
 0x199   : > { %v1757_v31 = vpop.permute.xlu0 %1756  ;;  %1134 = vrot.lane.b32.xlu1 %v4353_v30, %s3387_s14  ;;  %v2000_v26 = vsel %vm1980_vm7, %v1967_v16, %v4311_v14  ;;  %v1903_v16 = vsel %vm1881_vm4, %v4021_v18, %v4151_v17  ;;  %v771_v25 = vld [vmem:[#allocation2 + $0xb2] sm:$0xff] }
 0x19a   : > { %v2065_v5 = vsel %vm2046_vm9, %v2032_v27, %v1757_v31  ;;  %v2033_v42 = vsel %vm2013_vm8, %v2000_v26, %v1631_v35  ;;  %v785_v35 = vld [vmem:[#allocation2 + $0x15a] sm:$0xff]  ;;  %v706_v31 = vld [vmem:[#allocation2 + $0xa8] sm:$0xff] }
 0x19b   : > { %1640 = vrot.lane.b32.xlu0 %v752_v50, %s3391_s24  ;;  %3065 = vmatprep.mubr.msk.f32.mxu1 %vm2084_vm10, %v2065_v5  ;;  %v4380_v11 = vpop.permute.xlu1 %1344  ;;  %v1902_v5 = vsel %vm1881_vm4, %v4024_v19, %v4153_v37 }
 0x19c   : > { %v1935_v55 = vsel %vm1914_vm5, %v1902_v5, %v4336_v49  ;;  %v1952_v13 = vsel %vm1947_vm6, %v1919_v24, %v4380_v11  ;;  %v787_v5 = vld [vmem:[#allocation2 + $0x172] sm:$0xff] }
 0x19d   : > { %v4384_v45 = vpop.permute.xlu0 %1250  ;;  %1260 = vrot.lane.b32.xlu1 %v752_v50, %s3388_s15 }
 0x19f   : > { %1228 = vrot.lane.b32.xlu0 %v736_v39, %s3388_s15  ;;  %v1727_v10 = vpop.permute.xlu1 %1726  ;;  %v768_v39 = vld [vmem:[#allocation2 + $0x92] sm:$0xff] }
 0x1a0   : > { %v2050_v52 = vsel %vm2046_vm9, %v2017_v58, %v1727_v10  ;;  %v628_v58 = vld [vmem:[#allocation2 + $0x170] sm:$0xff] }
 0x1a1   : > { %v1377_v48 = vpop.permute.xlu0 %1376  ;;  %1642 = vrot.lane.b32.xlu1 %v753_v62, %s3391_s24  ;;  %3042 = vmatmul.mubr.msk.f32.gmra.mrb[2].mxu0 %vm2084_vm10, %v2050_v52  ;;  %v5173_v52 = vld [vmem:[#allocation7_spill] sm:$0xff] }
 0x1a2   : > { %v1968_v33 = vsel %vm1947_vm6, %v1935_v55, %v1377_v48  ;;  %v1821_v48 = vsel %vm437_vm0, %v3771_v1, %v5173_v52 }
 0x1a3   : > { %1610 = vrot.lane.b32.xlu0 %v737_v0, %s3391_s24  ;;  %v4410_v43 = vpop.permute.xlu1 %1346  ;;  %v1854_v46 = vsel %vm1848_vm2, %v1821_v48, %v3923_v28 }
 0x1a4   : > { %v1887_v26 = vsel %vm1881_vm4, %v1854_v46, %v4086_v44  ;;  %v755_v44 = vld [vmem:[#allocation2 + $0x171] sm:$0xff] }
 0x1a5   : > { %v1759_v7 = vpop.permute.xlu0 %1758  ;;  %1768 = vrot.lane.b32.xlu1 %v784_v20, %s3392_s9  ;;  %v1920_v1 = vsel %vm1914_vm5, %v1887_v26, %v4365_v22  ;;  %v739_v22 = vld [vmem:[#allocation2 + $0xb1] sm:$0xff] }
 0x1a6   : > { %v2066_v9 = vsel %vm2046_vm9, %v2033_v42, %v1759_v7  ;;  %v1953_v18 = vsel %vm1947_vm6, %v1920_v1, %v4410_v43  ;;  %v786_v43 = vld [vmem:[#allocation2 + $0x16a] sm:$0xff] }
 0x1a7   : > { %1736 = vrot.lane.b32.xlu0 %v768_v39, %s3392_s9  ;;  %3066 = vmatmul.mubr.msk.f32.gmra.mrb[2].mxu1 %vm2084_vm10, %v2066_v9  ;;  %v1473_v47 = vpop.permute.xlu1 %1472  ;;  %v725_v1 = vld [vmem:[#allocation2 + $0x188] sm:$0xff] }
 0x1a8   : > { %v1985_v36 = vsel %vm1980_vm7, %v1952_v13, %v1473_v47 }
 0x1a9   : > { %v4417_v59 = vpop.permute.xlu0 %1378  ;;  %1262 = vrot.lane.b32.xlu1 %v753_v62, %s3388_s15 }
 0x1ab   : > { %1230 = vrot.lane.b32.xlu0 %v737_v0, %s3388_s15  ;;  %v4421_v14 = vpop.permute.xlu1 %1474  ;;  %v754_v0 = vld [vmem:[#allocation2 + $0x169] sm:$0xff] }
 0x1ad   : > { %v1505_v12 = vpop.permute.xlu0 %1504  ;;  %1388 = vrot.lane.b32.xlu1 %v784_v20, %s3389_s16 }
 0x1ae   : > { %v2001_v19 = vsel %vm1980_vm7, %v1968_v33, %v1505_v12  ;;  %v724_v33 = vld [vmem:[#allocation2 + $0x180] sm:$0xff] }
 0x1af   : > { %1356 = vrot.lane.b32.xlu0 %v768_v39, %s3389_s16  ;;  %v1601_v8 = vpop.permute.xlu1 %1600  ;;  %v1936_v39 = vsel %vm1914_vm5, %v1903_v16, %v4384_v45  ;;  %v1986_v45 = vsel %vm1980_vm7, %v1953_v18, %v4421_v14 }
 0x1b0   : > { %v2018_v41 = vsel %vm2013_vm8, %v1985_v36, %v1601_v8  ;;  %v1969_v28 = vsel %vm1947_vm6, %v1936_v39, %v4417_v59  ;;  %v770_v8 = vld [vmem:[#allocation2 + $0xaa] sm:$0xff] }
 0x1b1   : > { %v1507_v32 = vpop.permute.xlu0 %1506  ;;  %1770 = vrot.lane.b32.xlu1 %v785_v35, %s3392_s9  ;;  %v5174_v36 = vld [vmem:[#allocation22_spill] sm:$0xff] }
 0x1b2   : > { %v2002_v17 = vsel %vm1980_vm7, %v1969_v28, %v1507_v32 }
 0x1b3   : > { %1738 = vrot.lane.b32.xlu0 %v769_v51, %s3392_s9  ;;  %v4427_v29 = vpop.permute.xlu1 %1126 }
 0x1b5   : > { %v1633_v50 = vpop.permute.xlu0 %1632  ;;  %1390 = vrot.lane.b32.xlu1 %v785_v35, %s3389_s16 }
 0x1b6   : > { %v2034_v37 = vsel %vm2013_vm8, %v2001_v19, %v1633_v50  ;;  %v708_v19 = vld [vmem:[#allocation2 + $0xc0] sm:$0xff] }
 0x1b7   : > { %1358 = vrot.lane.b32.xlu0 %v769_v51, %s3389_s16  ;;  %v4431_v27 = vpop.permute.xlu1 %1252 }
 0x1b9   : > { %v4435_v53 = vpop.permute.xlu0 %1220  ;;  %1516 = vrot.lane.b32.xlu1 %v4433_v61, %s3390_s17 }
 0x1bb   : > { %1484 = vrot.lane.b32.xlu0 %v706_v31, %s3390_s17  ;;  %v1635_v56 = vpop.permute.xlu1 %1634 }
 0x1bc   : > { %v2035_v7 = vsel %vm2013_vm8, %v2002_v17, %v1635_v56  ;;  %v756_v17 = vld [vmem:[#allocation2 + $0x181] sm:$0xff] }
 0x1bd   : > { %v1603_v54 = vpop.permute.xlu0 %1602  ;;  %1486 = vrot.lane.b32.xlu1 %v707_v38, %s3390_s17 }
 0x1be   : > { %v2019_v47 = vsel %vm2013_vm8, %v1986_v45, %v1603_v54  ;;  %v3296_v45 = vld [vmem:[#allocation2 + $0x110] sm:$0xff] }
 0x1bf   : > { %1136 = vrot.lane.b32.xlu0 %v4433_v61, %s3387_s14  ;;  %v1761_v49 = vpop.permute.xlu1 %1760 }
 0x1c0   : > { %v2067_v63 = vsel %vm2046_vm9, %v2034_v37, %v1761_v49  ;;  %v1838_v37 = vsel %vm437_vm0, %v3883_v57, %v5174_v36  ;;  %v3295_v49 = vld [vmem:[#allocation2 + $0x48] sm:$0xff] }
 0x1c1   : > { %v1729_v62 = vpop.permute.xlu0 %1728  ;;  %1612 = vrot.lane.b32.xlu1 %v738_v2, %s3391_s24  ;;  %3068 = vmatprep.mubr.msk.f32.mxu1 %vm2084_vm10, %v2067_v63 }
 0x1c2   : > { %v2051_v11 = vsel %vm2046_vm9, %v2018_v41, %v1729_v62  ;;  %v5175_v41 = vld [vmem:[#allocation10_spill] sm:$0xff]  ;;  %v1871_v62 = vsel %vm1848_vm2, %v1838_v37, %v4032_v21 }
 0x1c3   : > { %1518 = vrot.lane.b32.xlu0 %v4461_v6, %s3390_s17  ;;  %3044 = vmatprep.mubr.msk.f32.mxu0 %vm2084_vm10, %v2051_v11  ;;  %v4469_v10 = vpop.permute.xlu1 %1254  ;;  %v1822_v63 = vsel %vm437_vm0, %v3295_v49, %v5175_v41  ;;  %v709_v11 = vld [vmem:[#allocation2 + $0xc8] sm:$0xff] }
 0x1c4   : > { %v757_v37 = vld [vmem:[#allocation2 + $0x189] sm:$0xff] }
 0x1c5   : > { %v4471_v15 = vpop.permute.xlu0 %1222  ;;  %1138 = vrot.lane.b32.xlu1 %v628_v58, %s3387_s14  ;;  %v1855_v58 = vsel %vm1848_vm2, %v1822_v63, %v3937_v40  ;;  %v741_v41 = vld [vmem:[#allocation2 + $0xc9] sm:$0xff] }
 0x1c6   : > { %v1888_v57 = vsel %vm1881_vm4, %v1855_v58, %v4096_v34  ;;  %v740_v34 = vld [vmem:[#allocation2 + $0xc1] sm:$0xff] }
 0x1c7   : > { %1644 = vrot.lane.b32.xlu0 %v754_v0, %s3391_s24  ;;  %v4483_v20 = vpop.permute.xlu1 %1380  ;;  %v1921_v21 = vsel %vm1914_vm5, %v1888_v57, %v4435_v53 }
 0x1c9   : > { %v4489_v42 = vpop.permute.xlu0 %1348  ;;  %1264 = vrot.lane.b32.xlu1 %v754_v0, %s3388_s15  ;;  %v1904_v0 = vsel %vm1881_vm4, %v1871_v62, %v4158_v23 }
 0x1ca   : > { %v1937_v48 = vsel %vm1914_vm5, %v1904_v0, %v4431_v27  ;;  %v1954_v40 = vsel %vm1947_vm6, %v1921_v21, %v4489_v42 }
 0x1cb   : > { %1232 = vrot.lane.b32.xlu0 %v738_v2, %s3388_s15  ;;  %v1763_v9 = vpop.permute.xlu1 %1762  ;;  %v1970_v16 = vsel %vm1947_vm6, %v1937_v48, %v4483_v20 }
 0x1cc   : > { %v2068_v59 = vsel %vm2046_vm9, %v2035_v7, %v1763_v9  ;;  %v5176_v7 = vld [vmem:[#allocation20_spill] sm:$0xff] }
 0x1cd   : > { %v1731_v12 = vpop.permute.xlu0 %1730  ;;  %1646 = vrot.lane.b32.xlu1 %v755_v44, %s3391_s24  ;;  %3069 = vmatmul.mubr.msk.f32.gmra.mrb[4].mxu1 %vm2084_vm10, %v2068_v59  ;;  %v1839_v9 = vsel %vm437_vm0, %v3296_v45, %v5176_v7  ;;  %v5183_v7 = vld [vmem:[#allocation43_spill] sm:$0xff] }
 0x1ce   : > { %v2052_v35 = vsel %vm2046_vm9, %v2019_v47, %v1731_v12  ;;  %v5177_v47 = vld [vmem:[#allocation8_spill] sm:$0xff]  ;;  %v5178_v12 = vld [vmem:[#allocation41_spill] sm:$0xff] }
 0x1cf   : > { %1614 = vrot.lane.b32.xlu0 %v739_v22, %s3391_s24  ;;  %3045 = vmatmul.mubr.msk.f32.gmra.mrb[4].mxu0 %vm2084_vm10, %v2052_v35  ;;  %v4510_v14 = vpop.permute.xlu1 %1382  ;;  %v1872_v35 = vsel %vm1848_vm2, %v1839_v9, %v5178_v12 }
 0x1d1   : > { %v4512_v51 = vpop.permute.xlu0 %1350  ;;  %1772 = vrot.lane.b32.xlu1 %v786_v43, %s3392_s9 }
 0x1d3   : > { %1740 = vrot.lane.b32.xlu0 %v770_v8, %s3392_s9  ;;  %v1509_v32 = vpop.permute.xlu1 %1508 }
 0x1d4   : > { %v2003_v23 = vsel %vm1980_vm7, %v1970_v16, %v1509_v32  ;;  %v1905_v32 = vsel %vm1881_vm4, %v1872_v35, %v4427_v29  ;;  %v773_v16 = vld [vmem:[#allocation2 + $0xca] sm:$0xff] }
 0x1d5   : > { %v1477_v50 = vpop.permute.xlu0 %1476  ;;  %1266 = vrot.lane.b32.xlu1 %v755_v44, %s3388_s15 }
 0x1d6   : > { %v1987_v26 = vsel %vm1980_vm7, %v1954_v40, %v1477_v50 }
 0x1d7   : > { %1234 = vrot.lane.b32.xlu0 %v739_v22, %s3388_s15  ;;  %v4518_v31 = vpop.permute.xlu1 %1478  ;;  %v3297_v22 = vld [vmem:[#allocation2 + $0x50] sm:$0xff] }
 0x1d8   : > { %v1823_v59 = vsel %vm437_vm0, %v3297_v22, %v5177_v47  ;;  %v727_v22 = vld [vmem:[#allocation2 + $0x1a0] sm:$0xff]  ;;  %v5184_v47 = vld [vmem:[#allocation34_spill] sm:$0xff] }
 0x1d9   : > { %v4520_v38 = vpop.permute.xlu0 %1128  ;;  %1392 = vrot.lane.b32.xlu1 %v786_v43, %s3389_s16  ;;  %v5179_v43 = vld [vmem:[#allocation32_spill] sm:$0xff] }
 0x1db   : > { %1360 = vrot.lane.b32.xlu0 %v770_v8, %s3389_s16  ;;  %v1605_v56 = vpop.permute.xlu1 %1604  ;;  %v1856_v8 = vsel %vm1848_vm2, %v1823_v59, %v5179_v43  ;;  %v711_v43 = vld [vmem:[#allocation2 + $0xe0] sm:$0xff] }
 0x1dc   : > { %v2020_v53 = vsel %vm2013_vm8, %v1987_v26, %v1605_v56  ;;  %v726_v26 = vld [vmem:[#allocation2 + $0x198] sm:$0xff] }
 0x1dd   : > { %v4524_v55 = vpop.permute.xlu0 %1510  ;;  %1774 = vrot.lane.b32.xlu1 %v787_v5, %s3392_s9 }
 0x1df   : > { %1742 = vrot.lane.b32.xlu0 %v771_v25, %s3392_s9  ;;  %v4528_v54 = vpop.permute.xlu1 %1130 }
 0x1e1   : > { %v1637_v24 = vpop.permute.xlu0 %1636  ;;  %1394 = vrot.lane.b32.xlu1 %v787_v5, %s3389_s16  ;;  %v5180_v5 = vld [vmem:[#allocation50_spill] sm:$0xff] }
 0x1e2   : > { %v2036_v27 = vsel %vm2013_vm8, %v2003_v23, %v1637_v24  ;;  %v1889_v56 = vsel %vm1881_vm4, %v1856_v8, %v5180_v5  ;;  %v5185_v8 = vld [vmem:[#allocation52_spill] sm:$0xff] }
 0x1e3   : > { %1362 = vrot.lane.b32.xlu0 %v771_v25, %s3389_s16  ;;  %v4532_v13 = vpop.permute.xlu1 %1256  ;;  %v1938_v25 = vsel %vm1914_vm5, %v1905_v32, %v4469_v10 }
 0x1e5   : > { %v4534_v2 = vpop.permute.xlu0 %1224  ;;  %1520 = vrot.lane.b32.xlu1 %v724_v33, %s3390_s17 }
 0x1e7   : > { %1488 = vrot.lane.b32.xlu0 %v708_v19, %s3390_s17  ;;  %v1639_v52 = vpop.permute.xlu1 %1638  ;;  %v1971_v19 = vsel %vm1947_vm6, %v1938_v25, %v4510_v14 }
 0x1e8   : > { %v2004_v36 = vsel %vm1980_vm7, %v1971_v19, %v4524_v55 }
 0x1e9   : > { %v1607_v46 = vpop.permute.xlu0 %1606  ;;  %1490 = vrot.lane.b32.xlu1 %v709_v11, %s3390_s17  ;;  %v2037_v49 = vsel %vm2013_vm8, %v2004_v36, %v1639_v52  ;;  %v772_v11 = vld [vmem:[#allocation2 + $0xc2] sm:$0xff] }
 0x1eb   : > { %1140 = vrot.lane.b32.xlu0 %v724_v33, %s3387_s14  ;;  %v1765_v39 = vpop.permute.xlu1 %1764  ;;  %v1922_v33 = vsel %vm1914_vm5, %v1889_v56, %v4471_v15 }
 0x1ec   : > { %v2069_v20 = vsel %vm2046_vm9, %v2036_v27, %v1765_v39  ;;  %v1955_v29 = vsel %vm1947_vm6, %v1922_v33, %v4512_v51  ;;  %v710_v39 = vld [vmem:[#allocation2 + $0xd8] sm:$0xff] }
 0x1ed   : > { %v1733_v28 = vpop.permute.xlu0 %1732  ;;  %1616 = vrot.lane.b32.xlu1 %v740_v34, %s3391_s24  ;;  %3071 = vmatprep.mubr.msk.f32.mxu1 %vm2084_vm10, %v2069_v20  ;;  %v1988_v10 = vsel %vm1980_vm7, %v1955_v29, %v4518_v31  ;;  %v788_v31 = vld [vmem:[#allocation2 + $0x182] sm:$0xff]  ;;  %v758_v29 = vld [vmem:[#allocation2 + $0x199] sm:$0xff] }
 0x1ee   : > { %v2053_v18 = vsel %vm2046_vm9, %v2020_v53, %v1733_v28  ;;  %v2021_v14 = vsel %vm2013_vm8, %v1988_v10, %v1607_v46  ;;  %v789_v46 = vld [vmem:[#allocation2 + $0x18a] sm:$0xff]  ;;  %v3298_v53 = vld [vmem:[#allocation2 + $0x120] sm:$0xff] }
 0x1ef   : > { %1522 = vrot.lane.b32.xlu0 %v725_v1, %s3390_s17  ;;  %3047 = vmatprep.mubr.msk.f32.mxu0 %vm2084_vm10, %v2053_v18  ;;  %v4571_v42 = vpop.permute.xlu1 %1258  ;;  %v5181_v20 = vld [vmem:[#allocation25_spill] sm:$0xff]  ;;  %v3299_v18 = vld [vmem:[#allocation2 + $0x60] sm:$0xff] }
 0x1f0   : > { %v1840_v28 = vsel %vm437_vm0, %v3298_v53, %v5181_v20  ;;  %v742_v10 = vld [vmem:[#allocation2 + $0xd9] sm:$0xff] }
 0x1f1   : > { %v4573_v44 = vpop.permute.xlu0 %1226  ;;  %1142 = vrot.lane.b32.xlu1 %v725_v1, %s3387_s14  ;;  %v1873_v9 = vsel %vm1848_vm2, %v1840_v28, %v5183_v7  ;;  %v774_v20 = vld [vmem:[#allocation2 + $0xda] sm:$0xff] }
 0x1f2   : > { %v1906_v12 = vsel %vm1881_vm4, %v1873_v9, %v4520_v38  ;;  %v5191_v28 = vld [vmem:[#allocation51_spill] sm:$0xff] }
 0x1f3   : > { %1648 = vrot.lane.b32.xlu0 %v756_v17, %s3391_s24  ;;  %v4587_v50 = vpop.permute.xlu1 %1384  ;;  %v1939_v5 = vsel %vm1914_vm5, %v1906_v12, %v4532_v13  ;;  %v775_v12 = vld [vmem:[#allocation2 + $0xe2] sm:$0xff] }
 0x1f4   : > { %v1972_v33 = vsel %vm1947_vm6, %v1939_v5, %v4587_v50 }
 0x1f5   : > { %v4593_v24 = vpop.permute.xlu0 %1352  ;;  %1268 = vrot.lane.b32.xlu1 %v756_v17, %s3388_s15  ;;  %v5182_v17 = vld [vmem:[#allocation12_spill] sm:$0xff] }
 0x1f6   : > { %v1824_v45 = vsel %vm437_vm0, %v3299_v18, %v5182_v17 }
 0x1f7   : > { %1236 = vrot.lane.b32.xlu0 %v740_v34, %s3388_s15  ;;  %v1767_v15 = vpop.permute.xlu1 %1766  ;;  %v1857_v59 = vsel %vm1848_vm2, %v1824_v45, %v5184_v47  ;;  %v791_v47 = vld [vmem:[#allocation2 + $0x1a2] sm:$0xff] }
 0x1f8   : > { %v2070_v63 = vsel %vm2046_vm9, %v2037_v49, %v1767_v15  ;;  %v1890_v32 = vsel %vm1881_vm4, %v1857_v59, %v5185_v8 }
 0x1f9   : > { %v1735_v62 = vpop.permute.xlu0 %1734  ;;  %1650 = vrot.lane.b32.xlu1 %v757_v37, %s3391_s24  ;;  %3072 = vmatmul.mubr.msk.f32.gmra.mrb[6].mxu1 %vm2084_vm10, %v2070_v63  ;;  %v1923_v25 = vsel %vm1914_vm5, %v1890_v32, %v4534_v2 }
 0x1fa   : > { %v2054_v51 = vsel %vm2046_vm9, %v2021_v14, %v1735_v62  ;;  %v1956_v38 = vsel %vm1947_vm6, %v1923_v25, %v4593_v24  ;;  %v759_v24 = vld [vmem:[#allocation2 + $0x1a1] sm:$0xff] }
 0x1fb   : > { %1618 = vrot.lane.b32.xlu0 %v741_v41, %s3391_s24  ;;  %3048 = vmatmul.mubr.msk.f32.gmra.mrb[6].mxu0 %vm2084_vm10, %v2054_v51  ;;  %v4615_v55 = vpop.permute.xlu1 %1386  ;;  %v743_v14 = vld [vmem:[#allocation2 + $0xe1] sm:$0xff]  ;;  %v5187_v51 = vld [vmem:[#allocation59_spill] sm:$0xff] }
 0x1fc   : > { %v5186_v62 = vld [vmem:[#allocation24_spill] sm:$0xff] }
 0x1fd   : > { %v4617_v58 = vpop.permute.xlu0 %1354  ;;  %1776 = vrot.lane.b32.xlu1 %v788_v31, %s3392_s9 }
 0x1ff   : > { %1744 = vrot.lane.b32.xlu0 %v772_v11, %s3392_s9  ;;  %v1513_v0 = vpop.permute.xlu1 %1512 }
 0x200   : > { %v2005_v19 = vsel %vm1980_vm7, %v1972_v33, %v1513_v0  ;;  %v5188_v0 = vld [vmem:[#allocation11_spill] sm:$0xff] }
 0x201   : > { %v1481_v52 = vpop.permute.xlu0 %1480  ;;  %1270 = vrot.lane.b32.xlu1 %v757_v37, %s3388_s15 }
 0x202   : > { %v1989_v36 = vsel %vm1980_vm7, %v1956_v38, %v1481_v52 }
 0x203   : > { %1238 = vrot.lane.b32.xlu0 %v741_v41, %s3388_s15  ;;  %v4623_v57 = vpop.permute.xlu1 %1482 }
 0x205   : > { %v4625_v48 = vpop.permute.xlu0 %1132  ;;  %1396 = vrot.lane.b32.xlu1 %v788_v31, %s3389_s16  ;;  %v1841_v31 = vsel %vm437_vm0, %v5187_v51, %v5186_v62 }
 0x207   : > { %1364 = vrot.lane.b32.xlu0 %v772_v11, %s3389_s16  ;;  %v1609_v21 = vpop.permute.xlu1 %1608  ;;  %v3300_v11 = vld [vmem:[#allocation2 + $0x68] sm:$0xff] }
 0x208   : > { %v2022_v2 = vsel %vm2013_vm8, %v1989_v36, %v1609_v21  ;;  %v1825_v52 = vsel %vm437_vm0, %v3300_v11, %v5188_v0 }
 0x209   : > { %v4629_v40 = vpop.permute.xlu0 %1514  ;;  %1778 = vrot.lane.b32.xlu1 %v789_v46, %s3392_s9 }
 0x20b   : > { %1746 = vrot.lane.b32.xlu0 %v773_v16, %s3392_s9  ;;  %v4633_v23 = vpop.permute.xlu1 %1134 }
 0x20d   : > { %v1641_v34 = vpop.permute.xlu0 %1640  ;;  %1398 = vrot.lane.b32.xlu1 %v789_v46, %s3389_s16  ;;  %v5189_v46 = vld [vmem:[#allocation42_spill] sm:$0xff] }
 0x20e   : > { %v2038_v13 = vsel %vm2013_vm8, %v2005_v19, %v1641_v34  ;;  %v1874_v21 = vsel %vm1848_vm2, %v1841_v31, %v5189_v46  ;;  %v5190_v34 = vld [vmem:[#allocation33_spill] sm:$0xff]  ;;  %v5196_v31 = vld [vmem:[#allocation54_spill] sm:$0xff] }
 0x20f   : > { %1366 = vrot.lane.b32.xlu0 %v773_v16, %s3389_s16  ;;  %v4637_v27 = vpop.permute.xlu1 %1260  ;;  %v790_v16 = vld [vmem:[#allocation2 + $0x19a] sm:$0xff]  ;;  %s339_s16 = sand.u32 1, %s3367_s19  }
 0x210   : > { %s5052_s21 = scalar_lea.sflag [#allocation4], %s339_s16 }
 0x211   : > { %v4639_v1 = vpop.permute.xlu0 %1228  ;;  %1524 = vrot.lane.b32.xlu1 %v726_v26, %s3390_s17  ;;  %v1858_v26 = vsel %vm1848_vm2, %v1825_v52, %v5190_v34 }
 0x212   : > { %v1891_v18 = vsel %vm1881_vm4, %v1858_v26, %v5191_v28 }
 0x213   : > { %1492 = vrot.lane.b32.xlu0 %v710_v39, %s3390_s17  ;;  %v1643_v35 = vpop.permute.xlu1 %1642  ;;  %v1907_v39 = vsel %vm1881_vm4, %v1874_v21, %v4528_v54  ;;  %v1924_v7 = vsel %vm1914_vm5, %v1891_v18, %v4573_v44  ;;  %v5197_v18 = vld [vmem:[#allocation26_spill] sm:$0xff] }
 0x214   : > { %v1940_v17 = vsel %vm1914_vm5, %v1907_v39, %v4571_v42  ;;  %v1957_v54 = vsel %vm1947_vm6, %v1924_v7, %v4617_v58  ;;  %v5198_v7 = vld [vmem:[#allocation13_spill] sm:$0xff] }
 0x215   : > { %v1611_v56 = vpop.permute.xlu0 %1610  ;;  %1526 = vrot.lane.b32.xlu1 %v727_v22, %s3390_s17  ;;  %v1973_v9 = vsel %vm1947_vm6, %v1940_v17, %v4615_v55  ;;  %v1990_v42 = vsel %vm1980_vm7, %v1957_v54, %v4623_v57  ;;  %v1843_v17 = vsel %vm437_vm0, %v4228_v4, %v5197_v18  ;;  %v5199_v54 = vld [vmem:[#allocation44_spill] sm:$0xff]  ;;  %v5201_v4 = vld [vmem:[#allocation53_spill] sm:$0xff] }
 0x216   : > { %v2006_v22 = vsel %vm1980_vm7, %v1973_v9, %v4629_v40  ;;  %v2023_v55 = vsel %vm2013_vm8, %v1990_v42, %v1611_v56  ;;  %v5200_v42 = vld [vmem:[#allocation35_spill] sm:$0xff] }
 0x217   : > { %1494 = vrot.lane.b32.xlu0 %v711_v43, %s3390_s17  ;;  %v1769_v37 = vpop.permute.xlu1 %1768  ;;  %v2039_v59 = vsel %vm2013_vm8, %v2006_v22, %v1643_v35  ;;  %v1876_v22 = vsel %vm1848_vm2, %v1843_v17, %v5199_v54  ;;  %s2913_s17 = sshll.u32 %s339_s16, 8 }
 0x218   : > { %v2071_v50 = vsel %vm2046_vm9, %v2038_v13, %v1769_v37  ;;  %v5192_v13 = vld [vmem:[#allocation27_spill] sm:$0xff] }
 0x219   : > { %v1737_v49 = vpop.permute.xlu0 %1736  ;;  %1652 = vrot.lane.b32.xlu1 %v758_v29, %s3391_s24  ;;  %3074 = vmatprep.mubr.msk.f32.mxu1 %vm2084_vm10, %v2071_v50  ;;  %v1842_v37 = vsel %vm437_vm0, %v4203_v3, %v5192_v13 }
 0x21a   : > { %v2055_v15 = vsel %vm2046_vm9, %v2022_v2, %v1737_v49  ;;  %v5193_v2 = vld [vmem:[#allocation14_spill] sm:$0xff]  ;;  %v5194_v49 = vld [vmem:[#allocation45_spill] sm:$0xff] }
 0x21b   : > { %1620 = vrot.lane.b32.xlu0 %v742_v10, %s3391_s24  ;;  %3050 = vmatprep.mubr.msk.f32.mxu0 %vm2084_vm10, %v2055_v15  ;;  %v4675_v41 = vpop.permute.xlu1 %1262  ;;  %v3301_v10 = vld [vmem:[#allocation2 + $0x78] sm:$0xff]  ;;  %v1875_v15 = vsel %vm1848_vm2, %v1842_v37, %v5194_v49 }
 0x21c   : > { %v1826_v50 = vsel %vm437_vm0, %v3301_v10, %v5193_v2  ;;  %v1908_v62 = vsel %vm1881_vm4, %v1875_v15, %v4625_v48 }
 0x21d   : > { %v4677_v63 = vpop.permute.xlu0 %1230  ;;  %1654 = vrot.lane.b32.xlu1 %v759_v24, %s3391_s24  ;;  %v5195_v24 = vld [vmem:[#allocation36_spill] sm:$0xff]  ;;  %v1941_v3 = vsel %vm1914_vm5, %v1908_v62, %v4637_v27 }
 0x21f   : > { %1622 = vrot.lane.b32.xlu0 %v743_v14, %s3391_s24  ;;  %v1389_v53 = vpop.permute.xlu1 %1388  ;;  %v1859_v14 = vsel %vm1848_vm2, %v1826_v50, %v5195_v24  ;;  %s4842_s24 = scalar_lea.vmem [#allocation3], %s2913_s17 }
 0x220   : > { %v1892_v11 = vsel %vm1881_vm4, %v1859_v14, %v5196_v31  ;;  %v1974_v46 = vsel %vm1947_vm6, %v1941_v3, %v1389_v53  ;;  %s2759_s29 = sshll.u32 %s4842_s24, 4  ;;  %s5046_s29 = int_to_ptr.vmem [resolvable:$true] %s2759_s29 }
 0x221   : > { %v1357_v45 = vpop.permute.xlu0 %1356  ;;  %1780 = vrot.lane.b32.xlu1 %v790_v16, %s3392_s9  ;;  %v1925_v52 = vsel %vm1914_vm5, %v1892_v11, %v4639_v1  ;;  %s3305_s12 = scalar_lea.vmem %s5046_s29, 4096  ;;  %p3312_p1 = scmp.lt.s32.totalorder %s5046_s29, %s3310_s7 }
 0x222   : > { %v1958_v21 = vsel %vm1947_vm6, %v1925_v52, %v1357_v45  ;;  %v3302_v45 = vld [vmem:[#allocation2 + $0x80] sm:$0xff]  ;;  %p3306_p12 = scmp.ne.s32.totalorder %s5046_s29, %s3305_s12  ;;  %p3313_p2 = scmp.lt.s32.totalorder %s3311_s8, %s3305_s12 }
 0x223   : > { %1748 = vrot.lane.b32.xlu0 %v774_v20, %s3392_s9  ;;  %v1771_v44 = vpop.permute.xlu1 %1770  ;;  %v1827_v9 = vsel %vm437_vm0, %v3302_v45, %v5198_v7 }
 0x224   : > { %v2072_v43 = vsel %vm2046_vm9, %v2039_v59, %v1771_v44  ;;  %v1860_v59 = vsel %vm1848_vm2, %v1827_v9, %v5200_v42  ;;  %v1909_v44 = vsel %vm1881_vm4, %v1876_v22, %v4633_v23  ;;  %p3307_p13 = pnand %p3306_p12, %p3465_p4  ;;  %p3314_p3 = por %p3313_p2, %p3312_p1 }
 0x225   : > { %v1739_v8 = vpop.permute.xlu0 %1738  ;;  %1782 = vrot.lane.b32.xlu1 %v791_v47, %s3392_s9  ;;  %3075 = vmatmul.mubr.msk.f32.gmra.mrb[8].mxu1 %vm2084_vm10, %v2072_v43  ;;  %v4765_v47 = vld [vmem:[%s5102_s3] ss:$0 sm:$0xff]  ;;  %v1942_v43 = vsel %vm1914_vm5, %v1909_v44, %v4675_v41 }
 0x226   : > { %v2056_v58 = vsel %vm2046_vm9, %v2023_v55, %v1739_v8  ;;  %v1893_v55 = vsel %vm1881_vm4, %v1860_v59, %v5201_v4  ;;  %v5202_v4 = vld [vmem:[#allocation29_spill] sm:$0xff]  ;;  %p3308_p0 = pneg %p3307_p13 }
 0x227   : > { %1750 = vrot.lane.b32.xlu0 %v775_v12, %s3392_s9  ;;  %3051 = vmatmul.mubr.msk.f32.gmra.mrb[8].mxu0 %vm2084_vm10, %v2056_v58  ;;  %v1391_v57 = vpop.permute.xlu1 %1390  ;;  %v4782_v58 = vld [vmem:[%s5103_s4] ss:$0 sm:$0xff] }
 0x228   : > { %v1975_v23 = vsel %vm1947_vm6, %v1942_v43, %v1391_v57  ;;  %p3315_p5 = pnand %p3314_p3, %p3308_p0 }
 0x229   : > { %v1359_v40 = vpop.permute.xlu0 %1358 }
 0x22b   : > { %v1517_v35 = vpop.permute.xlu1 %1516 }
 0x22c   : > { %v2007_v16 = vsel %vm1980_vm7, %v1974_v46, %v1517_v35 }
 0x22d   : > { %v1485_v32 = vpop.permute.xlu0 %1484 }
 0x22e   : > { %v1991_v34 = vsel %vm1980_vm7, %v1958_v21, %v1485_v32  ;;  %v1926_v32 = vsel %vm1914_vm5, %v1893_v55, %v4677_v63  ;;  %v1844_v55 = vsel %vm437_vm0, %v4319_v60, %v5202_v4 }
 0x22f   : > { %v1487_v5 = vpop.permute.xlu1 %1486  ;;  %v1959_v13 = vsel %vm1947_vm6, %v1926_v32, %v1359_v40  ;;  %v5203_v32 = vld [vmem:[#allocation16_spill] sm:$0xff] }
 0x230   : > { %v1992_v10 = vsel %vm1980_vm7, %v1959_v13, %v1487_v5 }
 0x231   : > { %v4716_v25 = vpop.permute.xlu0 %1136 }
 0x233   : > { %v1613_v56 = vpop.permute.xlu1 %1612 }
 0x234   : > { %v2024_v39 = vsel %vm2013_vm8, %v1991_v34, %v1613_v56 }
 0x235   : > { %v1519_v33 = vpop.permute.xlu0 %1518 }
 0x236   : > { %v2008_v41 = vsel %vm1980_vm7, %v1975_v23, %v1519_v33 }
 0x237   : > { %v4718_v38 = vpop.permute.xlu1 %1138 }
 0x239   : > { %v1645_v19 = vpop.permute.xlu0 %1644 }
 0x23a   : > { %v2040_v48 = vsel %vm2013_vm8, %v2007_v16, %v1645_v19 }
 0x23b   : > { %v4720_v29 = vpop.permute.xlu1 %1264 }
 0x23d   : > { %v4722_v36 = vpop.permute.xlu0 %1232 }
 0x23f   : > { %v1647_v51 = vpop.permute.xlu1 %1646 }
 0x240   : > { %v2041_v2 = vsel %vm2013_vm8, %v2008_v41, %v1647_v51  ;;  %v5205_v41 = vld [vmem:[#allocation38_spill] sm:$0xff] }
 0x241   : > { %v1615_v0 = vpop.permute.xlu0 %1614 }
 0x242   : > { %v2025_v63 = vsel %vm2013_vm8, %v1992_v10, %v1615_v0 }
 0x243   : > { %v1773_v26 = vpop.permute.xlu1 %1772 }
 0x244   : > { %v2073_v20 = vsel %vm2046_vm9, %v2040_v48, %v1773_v26 }
 0x245   : > { %v1741_v27 = vpop.permute.xlu0 %1740  ;;  %3077 = vmatprep.mubr.msk.f32.mxu1 %vm2084_vm10, %v2073_v20 }
 0x246   : > { %v2057_v28 = vsel %vm2046_vm9, %v2024_v39, %v1741_v27 }
 0x247   : > { %3053 = vmatprep.mubr.msk.f32.mxu0 %vm2084_vm10, %v2057_v28  ;;  %v4751_v1 = vpop.permute.xlu1 %1266 }
 0x249   : > { %v4753_v53 = vpop.permute.xlu0 %1234 }
 0x24b   : > { %v4771_v12 = vpop.permute.xlu1 %1392 }
 0x24c   : > { %v3040_v35 = vpop.f32.mrb[0].mxu0 }
 0x24d   : > { %v4777_v8 = vpop.permute.xlu0 %1360  ;;  %v2417_v56 = vmul.f32 %v3040_v35, %v4765_v47  ;;  %v2251_v19 = vpop.f32.mrb[1].mxu0  ;;  %v3303_v35 = vld [vmem:[#allocation2 + $0x90] sm:$0xff] }
 0x24e   : > { %v2416_v37 = vmul.f32 %v4765_v47, %v2251_v19  ;;  %v1828_v23 = vsel %vm437_vm0, %v3303_v35, %v5203_v32  ;;  %v5211_v35 = vld [vmem:[#allocation55_spill] sm:$0xff] }
 0x24f   : > { %v2455_v50 = vadd.f32 %v4782_v58, %v2417_v56  ;;  %v1775_v49 = vpop.permute.xlu1 %1774  ;;  %v5204_v56 = vld [vmem:[#allocation47_spill] sm:$0xff] }
 0x250   : > { %v2454_v57 = vadd.f32 %v4782_v58, %v2416_v37  ;;  %v2074_v15 = vsel %vm2046_vm9, %v2041_v2, %v1775_v49  ;;  %v1877_v19 = vsel %vm1848_vm2, %v1844_v55, %v5204_v56  ;;  %v1861_v37 = vsel %vm1848_vm2, %v1828_v23, %v5205_v41 }
 0x251   : > { %v1743_v24 = vpop.permute.xlu0 %1742  ;;  %v2952_v14 = vmul.f32 -1.442695, %v2455_v50  ;;  %3078 = vmatmul.mubr.msk.f32.gmra.mrb[10].mxu1 %vm2084_vm10, %v2074_v15  ;;  %v1910_v10 = vsel %vm1881_vm4, %v1877_v19, %v4716_v25 }
 0x252   : > { %v2058_v40 = vsel %vm2046_vm9, %v2025_v63, %v1743_v24  ;;  %v3064_v33 = vpop.f32.mrb[0].mxu1  ;;  %v2951_v62 = vmul.f32 -1.442695, %v2454_v57  ;;  %v5206_v63 = vld [vmem:[#allocation56_spill] sm:$0xff]  ;;  %v1943_v15 = vsel %vm1914_vm5, %v1910_v10, %v4720_v29 }
 0x253   : > { %v2433_v5 = vmul.f32 %v3064_v33, %v4765_v47  ;;  %3054 = vmatmul.mubr.msk.f32.gmra.mrb[10].mxu0 %vm2084_vm10, %v2058_v40  ;;  %v2331_v51 = vpop.f32.mrb[1].mxu1  ;;  %3167 = vpow2.f32 %v2952_v14  ;;  %v4802_v11 = vpop.permute.xlu1 %1394  ;;  %v1894_v60 = vsel %vm1881_vm4, %v1861_v37, %v5206_v63  ;;  %v1976_v33 = vsel %vm1947_vm6, %v1943_v15, %v4771_v12 }
 0x254   : > { %v2432_v31 = vmul.f32 %v4765_v47, %v2331_v51  ;;  %3169 = vpow2.f32 %v2951_v62  ;;  %v1927_v40 = vsel %vm1914_vm5, %v1894_v60, %v4722_v36 }
 0x255   : > { %v2471_v3 = vadd.f32 %v4782_v58, %v2433_v5  ;;  %v4805_v0 = vpop.permute.xlu0 %1362  ;;  %v1960_v25 = vsel %vm1947_vm6, %v1927_v40, %v4777_v8 }
 0x256   : > { %v2470_v52 = vadd.f32 %v4782_v58, %v2432_v31 }
 0x257   : > { %v2968_v46 = vmul.f32 -1.442695, %v2471_v3  ;;  %v1521_v16 = vpop.permute.xlu1 %1520 }
 0x258   : > { %v2967_v21 = vmul.f32 -1.442695, %v2470_v52  ;;  %v2009_v29 = vsel %vm1980_vm7, %v1976_v33, %v1521_v16 }
 0x259   : > { %3171 = vpow2.f32 %v2968_v46  ;;  %v1489_v34 = vpop.permute.xlu0 %1488 }
 0x25a   : > { %3173 = vpow2.f32 %v2967_v21 }
 0x25b   : > { %v4808_v48 = vpop.permute.xlu1 %1490 }
 0x25d   : > { %v4810_v26 = vpop.permute.xlu0 %1140  ;;  %v3168_v39 = vpop.eup %3167 }
 0x25e   : > { %v3170_v20 = vpop.eup %3169  ;;  %v2583_v27 = vadd.f32 1.0, %v3168_v39 }
 0x25f   : > { %v2582_v28 = vadd.f32 1.0, %v3170_v20  ;;  %v1617_v18 = vpop.permute.xlu1 %1616 }
 0x260   : > { %3175 = vrcp.f32 %v2583_v27 }
 0x261   : > { %v4812_v17 = vpop.permute.xlu0 %1522  ;;  %3177 = vrcp.f32 %v2582_v28  ;;  %v3304_v28 = vld [vmem:[#allocation2 + $0x98] sm:$0xff] }
 0x263   : > { %v3172_v45 = vpop.eup %3171  ;;  %v4814_v54 = vpop.permute.xlu1 %1142 }
 0x264   : > { %v3174_v7 = vpop.eup %3173  ;;  %v2599_v9 = vadd.f32 1.0, %v3172_v45 }
 0x265   : > { %v2598_v22 = vadd.f32 1.0, %v3174_v7  ;;  %v1649_v42 = vpop.permute.xlu0 %1648  ;;  %v5209_v7 = vld [vmem:[#allocation46_spill] sm:$0xff] }
 0x266   : > { %3179 = vrcp.f32 %v2599_v9  ;;  %v2042_v36 = vsel %vm2013_vm8, %v2009_v29, %v1649_v42  ;;  %v5210_v42 = vld [vmem:[#allocation37_spill] sm:$0xff] }
 0x267   : > { %3181 = vrcp.f32 %v2598_v22  ;;  %v4819_v59 = vpop.permute.xlu1 %1268 }
 0x269   : > { %v4821_v44 = vpop.permute.xlu0 %1236 }
 0x26a   : > { %v3176_v43 = vpop.eup %3175 }
 0x26b   : > { %v3178_v13 = vpop.eup %3177  ;;  %v2679_v2 = vmul.f32 %v3176_v43, %v2455_v50  ;;  %v1651_v49 = vpop.permute.xlu1 %1650 }
 0x26c   : > { %v2678_v24 = vmul.f32 %v3178_v13, %v2454_v57  ;;  %v1993_v57 = vsel %vm1980_vm7, %v1960_v25, %v1489_v34 }
 0x26d   : > { %v1619_v14 = vpop.permute.xlu0 %1618  ;;  %2711 = vst [vmem:[%s4842_s24 + $0x8] sm:$0xff] %v2679_v2  ;;  %v2026_v51 = vsel %vm2013_vm8, %v1993_v57, %v1617_v18  ;;  %v5208_v18 = vld [vmem:[#allocation15_spill] sm:$0xff] }
 0x26e   : > { %2710 = vst [vmem:[%s4842_s24] sm:$0xff] %v2678_v24  ;;  %v1829_v45 = vsel %vm437_vm0, %v3304_v28, %v5208_v18  ;;  %v5213_v18 = vld [vmem:[#allocation49_spill] sm:$0xff] }
 0x26f   : > { %v1777_v62 = vpop.permute.xlu1 %1776  ;;  %v1862_v4 = vsel %vm1848_vm2, %v1829_v45, %v5210_v42  ;;  %v5215_v42 = vld [vmem:[#allocation40_spill] sm:$0xff] }
 0x270   : > { %v3180_v50 = vpop.eup %3179  ;;  %v2075_v31 = vsel %vm2046_vm9, %v2042_v36, %v1777_v62  ;;  %v1895_v32 = vsel %vm1881_vm4, %v1862_v4, %v5211_v35 }
 0x271   : > { %v3182_v12 = vpop.eup %3181  ;;  %v2695_v5 = vmul.f32 %v3180_v50, %v2471_v3  ;;  %v1745_v46 = vpop.permute.xlu0 %1744  ;;  %3080 = vmatprep.mubr.msk.f32.mxu1 %vm2084_vm10, %v2075_v31  ;;  %v5207_v3 = vld [vmem:[#allocation28_spill] sm:$0xff]  ;;  %v1928_v13 = vsel %vm1914_vm5, %v1895_v32, %v4753_v53  ;;  %v5216_v32 = vld [vmem:[#allocation30_spill] sm:$0xff] }
 0x272   : > { %v2694_v21 = vmul.f32 %v3182_v12, %v2470_v52  ;;  %v2059_v8 = vsel %vm2046_vm9, %v2026_v51, %v1745_v46  ;;  %v1845_v20 = vsel %vm437_vm0, %v4353_v30, %v5207_v3  ;;  %v1961_v10 = vsel %vm1947_vm6, %v1928_v13, %v4805_v0 }
 0x273   : > { %2727 = vst [vmem:[%s4842_s24 + $0x88] sm:$0xff] %v2695_v5  ;;  %3056 = vmatprep.mubr.msk.f32.mxu0 %vm2084_vm10, %v2059_v8  ;;  %v4858_v16 = vpop.permute.xlu1 %1270  ;;  %v1878_v9 = vsel %vm1848_vm2, %v1845_v20, %v5209_v7  ;;  %v1994_v53 = vsel %vm1980_vm7, %v1961_v10, %v4808_v48  ;;  %v5219_v10 = vld [vmem:[#allocation39_spill] sm:$0xff] }
 0x274   : > { %2726 = vst [vmem:[%s4842_s24 + $0x80] sm:$0xff] %v2694_v21  ;;  %v3043_v39 = vpop.f32.mrb[2].mxu0  ;;  %v1911_v55 = vsel %vm1881_vm4, %v1878_v9, %v4718_v38  ;;  %v2027_v40 = vsel %vm2013_vm8, %v1994_v53, %v1619_v14 }
 0x275   : > { %v4860_v34 = vpop.permute.xlu0 %1238  ;;  %v2419_v27 = vmul.f32 %v3043_v39, %v4765_v47  ;;  %v2261_v52 = vpop.f32.mrb[3].mxu0  ;;  %v1944_v23 = vsel %vm1914_vm5, %v1911_v55, %v4751_v1 }
 0x276   : > { %v2418_v22 = vmul.f32 %v4765_v47, %v2261_v52  ;;  %v1977_v38 = vsel %vm1947_vm6, %v1944_v23, %v4802_v11  ;;  %v5212_v52 = vld [vmem:[#allocation31_spill] sm:$0xff] }
 0x277   : > { %v4876_v30 = vadd.f32 %v4782_v58, %v2419_v27  ;;  %v1397_v43 = vpop.permute.xlu1 %1396  ;;  %v2010_v2 = vsel %vm1980_vm7, %v1977_v38, %v4812_v17  ;;  %v1846_v28 = vsel %vm437_vm0, %v4433_v61, %v5212_v52  ;;  %v1847_v61 = vsel %vm437_vm0, %v4461_v6, %v5216_v32 }
 0x278   : > { %v4883_v56 = vadd.f32 %v4782_v58, %v2418_v22  ;;  %v2043_v15 = vsel %vm2013_vm8, %v2010_v2, %v1651_v49  ;;  %v1879_v45 = vsel %vm1848_vm2, %v1846_v28, %v5213_v18  ;;  %v5214_v22 = vld [vmem:[#allocation58_spill] sm:$0xff] }
 0x279   : > { %v1365_v19 = vpop.permute.xlu0 %1364  ;;  %v2954_v41 = vmul.f32 -1.442695, %v4876_v30  ;;  %v1912_v7 = vsel %vm1881_vm4, %v1879_v45, %v4810_v26  ;;  %v1896_v4 = vsel %vm1881_vm4, %v5215_v42, %v5214_v22  ;;  %v5217_v26 = vld [vmem:[#allocation48_spill] sm:$0xff] }
 0x27a   : > { %v3067_v37 = vpop.f32.mrb[2].mxu1  ;;  %v2953_v1 = vmul.f32 -1.442695, %v4883_v56  ;;  %v1945_v55 = vsel %vm1914_vm5, %v1912_v7, %v4819_v59  ;;  %v1929_v23 = vsel %vm1914_vm5, %v1896_v4, %v4821_v44 }
 0x27b   : > { %v2435_v63 = vmul.f32 %v3067_v37, %v4765_v47  ;;  %v2341_v60 = vpop.f32.mrb[3].mxu1  ;;  %3183 = vpow2.f32 %v2954_v41  ;;  %v1779_v24 = vpop.permute.xlu1 %1778  ;;  %v1978_v13 = vsel %vm1947_vm6, %v1945_v55, %v1397_v43  ;;  %v1880_v41 = vsel %vm1848_vm2, %v1847_v61, %v5217_v26  ;;  %v5218_v37 = vld [vmem:[#allocation57_spill] sm:$0xff] }
 0x27c   : > { %v2434_v11 = vmul.f32 %v4765_v47, %v2341_v60  ;;  %3185 = vpow2.f32 %v2953_v1  ;;  %v2076_v17 = vsel %vm2046_vm9, %v2043_v15, %v1779_v24  ;;  %v1897_v2 = vsel %vm1881_vm4, %v5219_v10, %v5218_v37 }
 0x27d   : > { %v4902_v0 = vadd.f32 %v4782_v58, %v2435_v63  ;;  %v1747_v33 = vpop.permute.xlu0 %1746  ;;  %3081 = vmatmul.mubr.msk.f32.gmra.mrb[12].mxu1 %vm2084_vm10, %v2076_v17  ;;  %v1962_v59 = vsel %vm1947_vm6, %v1929_v23, %v1365_v19  ;;  %v1913_v6 = vsel %vm1881_vm4, %v1880_v41, %v4814_v54  ;;  %v1930_v54 = vsel %vm1914_vm5, %v1897_v2, %v4860_v34 }
 0x27e   : > { %v4906_v25 = vadd.f32 %v4782_v58, %v2434_v11  ;;  %v2060_v48 = vsel %vm2046_vm9, %v2027_v40, %v1747_v33  ;;  %v1946_v15 = vsel %vm1914_vm5, %v1913_v6, %v4858_v16 }
 0x27f   : > { %v2970_v49 = vmul.f32 -1.442695, %v4902_v0  ;;  %3057 = vmatmul.mubr.msk.f32.gmra.mrb[12].mxu0 %vm2084_vm10, %v2060_v48  ;;  %v1399_v29 = vpop.permute.xlu1 %1398 }
 0x280   : > { %v2969_v14 = vmul.f32 -1.442695, %v4906_v25 }
 0x281   : > { %3187 = vpow2.f32 %v2970_v49  ;;  %v1367_v50 = vpop.permute.xlu0 %1366 }
 0x282   : > { %3189 = vpow2.f32 %v2969_v14  ;;  %v1963_v16 = vsel %vm1947_vm6, %v1930_v54, %v1367_v50 }
 0x283   : > { %v1525_v57 = vpop.permute.xlu1 %1524 }
 0x284   : > { %v2011_v1 = vsel %vm1980_vm7, %v1978_v13, %v1525_v57 }
 0x285   : > { %v1493_v36 = vpop.permute.xlu0 %1492  ;;  %v3184_v62 = vpop.eup %3183 }
 0x286   : > { %v3186_v12 = vpop.eup %3185  ;;  %v2585_v5 = vadd.f32 1.0, %v3184_v62  ;;  %v1995_v43 = vsel %vm1980_vm7, %v1962_v59, %v1493_v36 }
 0x287   : > { %v2584_v51 = vadd.f32 1.0, %v3186_v12  ;;  %v1527_v31 = vpop.permute.xlu1 %1526 }
 0x288   : > { %3191 = vrcp.f32 %v2585_v5 }
 0x289   : > { %v1495_v46 = vpop.permute.xlu0 %1494  ;;  %3193 = vrcp.f32 %v2584_v51 }
 0x28a   : > { %v1996_v48 = vsel %vm1980_vm7, %v1963_v16, %v1495_v46 }
 0x28b   : > { %v3188_v21 = vpop.eup %3187  ;;  %v1653_v3 = vpop.permute.xlu1 %1652 }
 0x28c   : > { %v3190_v8 = vpop.eup %3189  ;;  %v2601_v39 = vadd.f32 1.0, %v3188_v21  ;;  %v2044_v60 = vsel %vm2013_vm8, %v2011_v1, %v1653_v3 }
 0x28d   : > { %v2600_v20 = vadd.f32 1.0, %v3190_v8  ;;  %v1621_v27 = vpop.permute.xlu0 %1620 }
 0x28e   : > { %3195 = vrcp.f32 %v2601_v39  ;;  %v2028_v19 = vsel %vm2013_vm8, %v1995_v43, %v1621_v27 }
 0x28f   : > { %3197 = vrcp.f32 %v2600_v20  ;;  %v1655_v9 = vpop.permute.xlu1 %1654 }
 0x291   : > { %v1623_v35 = vpop.permute.xlu0 %1622 }
 0x292   : > { %v3192_v38 = vpop.eup %3191  ;;  %v2029_v57 = vsel %vm2013_vm8, %v1996_v48, %v1623_v35 }
 0x293   : > { %v3194_v63 = vpop.eup %3193  ;;  %v2681_v44 = vmul.f32 %v3192_v38, %v4876_v30  ;;  %v1781_v53 = vpop.permute.xlu1 %1780  ;;  %v1979_v30 = vsel %vm1947_vm6, %v1946_v15, %v1399_v29 }
 0x294   : > { %v2680_v11 = vmul.f32 %v3194_v63, %v4883_v56  ;;  %v2077_v24 = vsel %vm2046_vm9, %v2044_v60, %v1781_v53  ;;  %v2012_v56 = vsel %vm1980_vm7, %v1979_v30, %v1527_v31 }
 0x295   : > { %v1749_v40 = vpop.permute.xlu0 %1748  ;;  %2713 = vst [vmem:[%s4842_s24 + $0x18] sm:$0xff] %v2681_v44  ;;  %3083 = vmatprep.mubr.msk.f32.mxu1 %vm2084_vm10, %v2077_v24  ;;  %v2045_v34 = vsel %vm2013_vm8, %v2012_v56, %v1655_v9 }
 0x296   : > { %v2061_v17 = vsel %vm2046_vm9, %v2028_v19, %v1749_v40  ;;  %2712 = vst [vmem:[%s4842_s24 + $0x10] sm:$0xff] %v2680_v11 }
 0x297   : > { %3059 = vmatprep.mubr.msk.f32.mxu0 %vm2084_vm10, %v2061_v17  ;;  %v1783_v49 = vpop.permute.xlu1 %1782 }
 0x298   : > { %v3196_v33 = vpop.eup %3195  ;;  %v2078_v36 = vsel %vm2046_vm9, %v2045_v34, %v1783_v49 }
 0x299   : > { %v3198_v14 = vpop.eup %3197  ;;  %v2697_v29 = vmul.f32 %v3196_v33, %v4902_v0  ;;  %v1751_v62 = vpop.permute.xlu0 %1750  ;;  %3084 = vmatmul.mubr.msk.f32.gmra.mrb[14].mxu1 %vm2084_vm10, %v2078_v36 }
 0x29a   : > { %v2696_v50 = vmul.f32 %v3198_v14, %v4906_v25  ;;  %v2062_v12 = vsel %vm2046_vm9, %v2029_v57, %v1751_v62 }
 0x29b   : > { %2729 = vst [vmem:[%s4842_s24 + $0x98] sm:$0xff] %v2697_v29  ;;  %3060 = vmatmul.mubr.msk.f32.gmra.mrb[14].mxu0 %vm2084_vm10, %v2062_v12 }
 0x29c   : > { %2728 = vst [vmem:[%s4842_s24 + $0x90] sm:$0xff] %v2696_v50 }
 0x2a0   : > { %v3070_v5 = vpop.f32.mrb[4].mxu1 }
 0x2a1   : > { %v2437_v31 = vmul.f32 %v3070_v5, %v4765_v47  ;;  %v2351_v0 = vpop.f32.mrb[5].mxu1 }
 0x2a2   : > { %v3046_v51 = vpop.f32.mrb[4].mxu0  ;;  %v2436_v8 = vmul.f32 %v4765_v47, %v2351_v0 }
 0x2a3   : > { %v2421_v46 = vmul.f32 %v3046_v51, %v4765_v47  ;;  %v2271_v21 = vpop.f32.mrb[5].mxu0  ;;  %v2475_v25 = vadd.f32 %v4782_v58, %v2437_v31 }
 0x2a4   : > { %v2420_v39 = vmul.f32 %v4765_v47, %v2271_v21  ;;  %v2474_v20 = vadd.f32 %v4782_v58, %v2436_v8 }
 0x2a5   : > { %v2459_v3 = vadd.f32 %v4782_v58, %v2421_v46  ;;  %v2972_v27 = vmul.f32 -1.442695, %v2475_v25 }
 0x2a6   : > { %v2458_v52 = vadd.f32 %v4782_v58, %v2420_v39  ;;  %v2971_v18 = vmul.f32 -1.442695, %v2474_v20 }
 0x2a7   : > { %v2956_v28 = vmul.f32 -1.442695, %v2459_v3  ;;  %3199 = vpow2.f32 %v2972_v27 }
 0x2a8   : > { %v2955_v45 = vmul.f32 -1.442695, %v2458_v52 }
 0x2a9   : > { %3201 = vpow2.f32 %v2956_v28 }
 0x2aa   : > { %3203 = vpow2.f32 %v2955_v45 }
 0x2ab   : > { %3205 = vpow2.f32 %v2971_v18 }
 0x2b1   : > { %v3200_v7 = vpop.eup %3199 }
 0x2b2   : > { %v2603_v22 = vadd.f32 1.0, %v3200_v7 }
 0x2b3   : > { %v3202_v9 = vpop.eup %3201 }
 0x2b4   : > { %v3204_v42 = vpop.eup %3203  ;;  %v2587_v4 = vadd.f32 1.0, %v3202_v9  ;;  %3207 = vrcp.f32 %v2603_v22 }
 0x2b5   : > { %v3206_v55 = vpop.eup %3205  ;;  %v2586_v35 = vadd.f32 1.0, %v3204_v42 }
 0x2b6   : > { %3209 = vrcp.f32 %v2587_v4  ;;  %v2602_v32 = vadd.f32 1.0, %v3206_v55 }
 0x2b7   : > { %3211 = vrcp.f32 %v2586_v35 }
 0x2b8   : > { %3213 = vrcp.f32 %v2602_v32 }
 0x2be   : > { %v3208_v61 = vpop.eup %3207 }
 0x2bf   : > { %v2699_v13 = vmul.f32 %v3208_v61, %v2475_v25 }
 0x2c0   : > { %v3210_v23 = vpop.eup %3209 }
 0x2c1   : > { %v3212_v38 = vpop.eup %3211  ;;  %v2683_v26 = vmul.f32 %v3210_v23, %v2459_v3  ;;  %2731 = vst [vmem:[%s4842_s24 + $0xa8] sm:$0xff] %v2699_v13 }
 0x2c2   : > { %v3214_v41 = vpop.eup %3213  ;;  %v2682_v37 = vmul.f32 %v3212_v38, %v2458_v52 }
 0x2c3   : > { %2715 = vst [vmem:[%s4842_s24 + $0x28] sm:$0xff] %v2683_v26  ;;  %v2698_v10 = vmul.f32 %v3214_v41, %v2474_v20 }
 0x2c4   : > { %2714 = vst [vmem:[%s4842_s24 + $0x20] sm:$0xff] %v2682_v37 }
 0x2c5   : > { %2730 = vst [vmem:[%s4842_s24 + $0xa0] sm:$0xff] %v2698_v10 }
 0x2cc   : > { %v3073_v2 = vpop.f32.mrb[6].mxu1 }
 0x2cd   : > { %v2439_v1 = vmul.f32 %v3073_v2, %v4765_v47  ;;  %v2361_v63 = vpop.f32.mrb[7].mxu1 }
 0x2ce   : > { %v3049_v59 = vpop.f32.mrb[6].mxu0  ;;  %v2438_v43 = vmul.f32 %v4765_v47, %v2361_v63 }
 0x2cf   : > { %v2423_v6 = vmul.f32 %v3049_v59, %v4765_v47  ;;  %v2281_v44 = vpop.f32.mrb[7].mxu0  ;;  %v2477_v60 = vadd.f32 %v4782_v58, %v2439_v1 }
 0x2d0   : > { %v2422_v53 = vmul.f32 %v4765_v47, %v2281_v44  ;;  %v2476_v11 = vadd.f32 %v4782_v58, %v2438_v43 }
 0x2d1   : > { %v2461_v15 = vadd.f32 %v4782_v58, %v2423_v6  ;;  %v2974_v19 = vmul.f32 -1.442695, %v2477_v60 }
 0x2d2   : > { %v2460_v24 = vadd.f32 %v4782_v58, %v2422_v53  ;;  %v2973_v54 = vmul.f32 -1.442695, %v2476_v11 }
 0x2d3   : > { %v2958_v40 = vmul.f32 -1.442695, %v2461_v15  ;;  %3215 = vpow2.f32 %v2974_v19 }
 0x2d4   : > { %v2957_v30 = vmul.f32 -1.442695, %v2460_v24 }
 0x2d5   : > { %3217 = vpow2.f32 %v2958_v40 }
 0x2d6   : > { %3219 = vpow2.f32 %v2957_v30 }
 0x2d7   : > { %3221 = vpow2.f32 %v2973_v54 }
 0x2dd   : > { %v3216_v17 = vpop.eup %3215 }
 0x2de   : > { %v2605_v56 = vadd.f32 1.0, %v3216_v17 }
 0x2df   : > { %v3218_v16 = vpop.eup %3217 }
 0x2e0   : > { %v3220_v33 = vpop.eup %3219  ;;  %v2589_v48 = vadd.f32 1.0, %v3218_v16  ;;  %3223 = vrcp.f32 %v2605_v56 }
 0x2e1   : > { %v3222_v34 = vpop.eup %3221  ;;  %v2588_v49 = vadd.f32 1.0, %v3220_v33 }
 0x2e2   : > { %3225 = vrcp.f32 %v2589_v48  ;;  %v2604_v14 = vadd.f32 1.0, %v3222_v34 }
 0x2e3   : > { %3227 = vrcp.f32 %v2588_v49 }
 0x2e4   : > { %3229 = vrcp.f32 %v2604_v14 }
 0x2ea   : > { %v3224_v29 = vpop.eup %3223 }
 0x2eb   : > { %v2701_v36 = vmul.f32 %v3224_v29, %v2477_v60 }
 0x2ec   : > { %v3226_v57 = vpop.eup %3225 }
 0x2ed   : > { %v3228_v62 = vpop.eup %3227  ;;  %v2685_v50 = vmul.f32 %v3226_v57, %v2461_v15  ;;  %2733 = vst [vmem:[%s4842_s24 + $0xb8] sm:$0xff] %v2701_v36 }
 0x2ee   : > { %v3230_v12 = vpop.eup %3229  ;;  %v2684_v5 = vmul.f32 %v3228_v62, %v2460_v24 }
 0x2ef   : > { %2717 = vst [vmem:[%s4842_s24 + $0x38] sm:$0xff] %v2685_v50  ;;  %v2700_v51 = vmul.f32 %v3230_v12, %v2476_v11 }
 0x2f0   : > { %2716 = vst [vmem:[%s4842_s24 + $0x30] sm:$0xff] %v2684_v5 }
 0x2f1   : > { %2732 = vst [vmem:[%s4842_s24 + $0xb0] sm:$0xff] %v2700_v51 }
 0x2f8   : > { %v3076_v31 = vpop.f32.mrb[8].mxu1 }
 0x2f9   : > { %v2441_v46 = vmul.f32 %v3076_v31, %v4765_v47  ;;  %v2371_v21 = vpop.f32.mrb[9].mxu1 }
 0x2fa   : > { %v3052_v0 = vpop.f32.mrb[8].mxu0  ;;  %v2440_v39 = vmul.f32 %v4765_v47, %v2371_v21 }
 0x2fb   : > { %v2425_v8 = vmul.f32 %v3052_v0, %v4765_v47  ;;  %v2291_v25 = vpop.f32.mrb[9].mxu0  ;;  %v2479_v3 = vadd.f32 %v4782_v58, %v2441_v46 }
 0x2fc   : > { %v2424_v20 = vmul.f32 %v4765_v47, %v2291_v25  ;;  %v2478_v52 = vadd.f32 %v4782_v58, %v2440_v39 }
 0x2fd   : > { %v2463_v27 = vadd.f32 %v4782_v58, %v2425_v8  ;;  %v2976_v28 = vmul.f32 -1.442695, %v2479_v3 }
 0x2fe   : > { %v2462_v18 = vadd.f32 %v4782_v58, %v2424_v20  ;;  %v2975_v7 = vmul.f32 -1.442695, %v2478_v52 }
 0x2ff   : > { %v2960_v45 = vmul.f32 -1.442695, %v2463_v27  ;;  %3231 = vpow2.f32 %v2976_v28 }
 0x300   : > { %v2959_v9 = vmul.f32 -1.442695, %v2462_v18 }
 0x301   : > { %3233 = vpow2.f32 %v2960_v45 }
 0x302   : > { %3235 = vpow2.f32 %v2959_v9 }
 0x303   : > { %3237 = vpow2.f32 %v2975_v7 }
 0x309   : > { %v3232_v22 = vpop.eup %3231 }
 0x30a   : > { %v2607_v4 = vadd.f32 1.0, %v3232_v22 }
 0x30b   : > { %v3234_v42 = vpop.eup %3233 }
 0x30c   : > { %v3236_v55 = vpop.eup %3235  ;;  %v2591_v35 = vadd.f32 1.0, %v3234_v42  ;;  %3239 = vrcp.f32 %v2607_v4 }
 0x30d   : > { %v3238_v32 = vpop.eup %3237  ;;  %v2590_v61 = vadd.f32 1.0, %v3236_v55 }
 0x30e   : > { %3241 = vrcp.f32 %v2591_v35  ;;  %v2606_v23 = vadd.f32 1.0, %v3238_v32 }
 0x30f   : > { %3243 = vrcp.f32 %v2590_v61 }
 0x310   : > { %3245 = vrcp.f32 %v2606_v23 }
 0x316   : > { %v3240_v13 = vpop.eup %3239 }
 0x317   : > { %v2703_v26 = vmul.f32 %v3240_v13, %v2479_v3 }
 0x318   : > { %v3242_v38 = vpop.eup %3241 }
 0x319   : > { %v3244_v41 = vpop.eup %3243  ;;  %v2687_v37 = vmul.f32 %v3242_v38, %v2463_v27  ;;  %2735 = vst [vmem:[%s4842_s24 + $0xc8] sm:$0xff] %v2703_v26 }
 0x31a   : > { %v3246_v10 = vpop.eup %3245  ;;  %v2686_v2 = vmul.f32 %v3244_v41, %v2462_v18 }
 0x31b   : > { %2719 = vst [vmem:[%s4842_s24 + $0x48] sm:$0xff] %v2687_v37  ;;  %v2702_v59 = vmul.f32 %v3246_v10, %v2478_v52 }
 0x31c   : > { %2718 = vst [vmem:[%s4842_s24 + $0x40] sm:$0xff] %v2686_v2 }
 0x31d   : > { %2734 = vst [vmem:[%s4842_s24 + $0xc0] sm:$0xff] %v2702_v59 }
 0x324   : > { %v3079_v1 = vpop.f32.mrb[10].mxu1 }
 0x325   : > { %v2443_v6 = vmul.f32 %v3079_v1, %v4765_v47  ;;  %v2381_v44 = vpop.f32.mrb[11].mxu1 }
 0x326   : > { %v3055_v63 = vpop.f32.mrb[10].mxu0  ;;  %v2442_v53 = vmul.f32 %v4765_v47, %v2381_v44 }
 0x327   : > { %v2427_v43 = vmul.f32 %v3055_v63, %v4765_v47  ;;  %v2301_v60 = vpop.f32.mrb[11].mxu0  ;;  %v2481_v15 = vadd.f32 %v4782_v58, %v2443_v6 }
 0x328   : > { %v2426_v11 = vmul.f32 %v4765_v47, %v2301_v60  ;;  %v2480_v24 = vadd.f32 %v4782_v58, %v2442_v53 }
 0x329   : > { %v2465_v19 = vadd.f32 %v4782_v58, %v2427_v43  ;;  %v2978_v40 = vmul.f32 -1.442695, %v2481_v15 }
 0x32a   : > { %v2464_v54 = vadd.f32 %v4782_v58, %v2426_v11  ;;  %v2977_v17 = vmul.f32 -1.442695, %v2480_v24 }
 0x32b   : > { %v2962_v30 = vmul.f32 -1.442695, %v2465_v19  ;;  %3247 = vpow2.f32 %v2978_v40 }
 0x32c   : > { %v2961_v16 = vmul.f32 -1.442695, %v2464_v54 }
 0x32d   : > { %3249 = vpow2.f32 %v2962_v30 }
 0x32e   : > { %3251 = vpow2.f32 %v2961_v16 }
 0x32f   : > { %3253 = vpow2.f32 %v2977_v17 }
 0x335   : > { %v3248_v56 = vpop.eup %3247 }
 0x336   : > { %v2609_v48 = vadd.f32 1.0, %v3248_v56 }
 0x337   : > { %v3250_v33 = vpop.eup %3249 }
 0x338   : > { %v3252_v34 = vpop.eup %3251  ;;  %v2593_v49 = vadd.f32 1.0, %v3250_v33  ;;  %3255 = vrcp.f32 %v2609_v48 }
 0x339   : > { %v3254_v14 = vpop.eup %3253  ;;  %v2592_v29 = vadd.f32 1.0, %v3252_v34 }
 0x33a   : > { %3257 = vrcp.f32 %v2593_v49  ;;  %v2608_v57 = vadd.f32 1.0, %v3254_v14 }
 0x33b   : > { %3259 = vrcp.f32 %v2592_v29 }
 0x33c   : > { %3261 = vrcp.f32 %v2608_v57 }
 0x342   : > { %v3256_v36 = vpop.eup %3255 }
 0x343   : > { %v2705_v50 = vmul.f32 %v3256_v36, %v2481_v15 }
 0x344   : > { %v3258_v62 = vpop.eup %3257 }
 0x345   : > { %v3260_v12 = vpop.eup %3259  ;;  %v2689_v5 = vmul.f32 %v3258_v62, %v2465_v19  ;;  %2737 = vst [vmem:[%s4842_s24 + $0xd8] sm:$0xff] %v2705_v50 }
 0x346   : > { %v3262_v51 = vpop.eup %3261  ;;  %v2688_v31 = vmul.f32 %v3260_v12, %v2464_v54 }
 0x347   : > { %2721 = vst [vmem:[%s4842_s24 + $0x58] sm:$0xff] %v2689_v5  ;;  %v2704_v0 = vmul.f32 %v3262_v51, %v2480_v24 }
 0x348   : > { %2720 = vst [vmem:[%s4842_s24 + $0x50] sm:$0xff] %v2688_v31 }
 0x349   : > { %2736 = vst [vmem:[%s4842_s24 + $0xd0] sm:$0xff] %v2704_v0 }
 0x350   : > { %v3082_v46 = vpop.f32.mrb[12].mxu1 }
 0x351   : > { %v2445_v8 = vmul.f32 %v3082_v46, %v4765_v47  ;;  %v2391_v25 = vpop.f32.mrb[13].mxu1 }
 0x352   : > { %v3058_v21 = vpop.f32.mrb[12].mxu0  ;;  %v2444_v20 = vmul.f32 %v4765_v47, %v2391_v25 }
 0x353   : > { %v2429_v39 = vmul.f32 %v3058_v21, %v4765_v47  ;;  %v2311_v3 = vpop.f32.mrb[13].mxu0  ;;  %v2483_v27 = vadd.f32 %v4782_v58, %v2445_v8 }
 0x354   : > { %v2428_v52 = vmul.f32 %v4765_v47, %v2311_v3  ;;  %v2482_v18 = vadd.f32 %v4782_v58, %v2444_v20 }
 0x355   : > { %v2467_v28 = vadd.f32 %v4782_v58, %v2429_v39  ;;  %v2980_v45 = vmul.f32 -1.442695, %v2483_v27 }
 0x356   : > { %v2466_v7 = vadd.f32 %v4782_v58, %v2428_v52  ;;  %v2979_v22 = vmul.f32 -1.442695, %v2482_v18 }
 0x357   : > { %v2964_v9 = vmul.f32 -1.442695, %v2467_v28  ;;  %3263 = vpow2.f32 %v2980_v45 }
 0x358   : > { %v2963_v42 = vmul.f32 -1.442695, %v2466_v7 }
 0x359   : > { %3265 = vpow2.f32 %v2964_v9 }
 0x35a   : > { %3267 = vpow2.f32 %v2963_v42 }
 0x35b   : > { %3269 = vpow2.f32 %v2979_v22 }
 0x361   : > { %v3264_v4 = vpop.eup %3263 }
 0x362   : > { %v2611_v35 = vadd.f32 1.0, %v3264_v4 }
 0x363   : > { %v3266_v55 = vpop.eup %3265 }
 0x364   : > { %v3268_v32 = vpop.eup %3267  ;;  %v2595_v61 = vadd.f32 1.0, %v3266_v55  ;;  %3271 = vrcp.f32 %v2611_v35 }
 0x365   : > { %v3270_v23 = vpop.eup %3269  ;;  %v2594_v13 = vadd.f32 1.0, %v3268_v32 }
 0x366   : > { %3273 = vrcp.f32 %v2595_v61  ;;  %v2610_v38 = vadd.f32 1.0, %v3270_v23 }
 0x367   : > { %3275 = vrcp.f32 %v2594_v13 }
 0x368   : > { %3277 = vrcp.f32 %v2610_v38 }
 0x36c   : > { %v3085_v26 = vpop.f32.mrb[14].mxu1 }
 0x36d   : > { %v2447_v37 = vmul.f32 %v3085_v26, %v4765_v47  ;;  %v2401_v10 = vpop.f32.mrb[15].mxu1 }
 0x36e   : > { %v3061_v41 = vpop.f32.mrb[14].mxu0  ;;  %v3272_v2 = vpop.eup %3271  ;;  %v2446_v63 = vmul.f32 %v4765_v47, %v2401_v10 }
 0x36f   : > { %v2431_v59 = vmul.f32 %v3061_v41, %v4765_v47  ;;  %v2321_v1 = vpop.f32.mrb[15].mxu0  ;;  %v2707_v44 = vmul.f32 %v3272_v2, %v2483_v27  ;;  %v2485_v43 = vadd.f32 %v4782_v58, %v2447_v37 }
 0x370   : > { %v3274_v6 = vpop.eup %3273  ;;  %v2430_v60 = vmul.f32 %v4765_v47, %v2321_v1  ;;  %v2484_v19 = vadd.f32 %v4782_v58, %v2446_v63 }
 0x371   : > { %v3276_v53 = vpop.eup %3275  ;;  %v2691_v15 = vmul.f32 %v3274_v6, %v2467_v28  ;;  %v2469_v11 = vadd.f32 %v4782_v58, %v2431_v59  ;;  %2739 = vst [vmem:[%s4842_s24 + $0xe8] sm:$0xff] %v2707_v44  ;;  %v2982_v54 = vmul.f32 -1.442695, %v2485_v43 }
 0x372   : > { %v3278_v24 = vpop.eup %3277  ;;  %v2690_v40 = vmul.f32 %v3276_v53, %v2466_v7  ;;  %v2468_v30 = vadd.f32 %v4782_v58, %v2430_v60  ;;  %v2981_v56 = vmul.f32 -1.442695, %v2484_v19 }
 0x373   : > { %2723 = vst [vmem:[%s4842_s24 + $0x68] sm:$0xff] %v2691_v15  ;;  %v2706_v17 = vmul.f32 %v3278_v24, %v2482_v18  ;;  %v2966_v16 = vmul.f32 -1.442695, %v2469_v11  ;;  %3279 = vpow2.f32 %v2982_v54 }
 0x374   : > { %2722 = vst [vmem:[%s4842_s24 + $0x60] sm:$0xff] %v2690_v40  ;;  %v2965_v47 = vmul.f32 -1.442695, %v2468_v30 }
 0x375   : > { %2738 = vst [vmem:[%s4842_s24 + $0xe0] sm:$0xff] %v2706_v17  ;;  %3281 = vpow2.f32 %v2966_v16 }
 0x376   : > { %3283 = vpow2.f32 %v2965_v47 }
 0x377   : > { %3285 = vpow2.f32 %v2981_v56 }
 0x37d   : > { %v3280_v33 = vpop.eup %3279 }
 0x37e   : > { %v2613_v34 = vadd.f32 1.0, %v3280_v33 }
 0x37f   : > { %v3282_v48 = vpop.eup %3281 }
 0x380   : > { %v3284_v49 = vpop.eup %3283  ;;  %v2597_v14 = vadd.f32 1.0, %v3282_v48  ;;  %3287 = vrcp.f32 %v2613_v34 }
 0x381   : > { %v3286_v58 = vpop.eup %3285  ;;  %v2596_v29 = vadd.f32 1.0, %v3284_v49 }
 0x382   : > { %3289 = vrcp.f32 %v2597_v14  ;;  %v2612_v57 = vadd.f32 1.0, %v3286_v58 }
 0x383   : > { %3291 = vrcp.f32 %v2596_v29 }
 0x384   : > { %3293 = vrcp.f32 %v2612_v57 }
 0x38a   : > { %v3288_v36 = vpop.eup %3287 }
 0x38b   : > { %v2709_v50 = vmul.f32 %v3288_v36, %v2485_v43 }
 0x38c   : > { %v3290_v62 = vpop.eup %3289 }
 0x38d   : > { %v3292_v12 = vpop.eup %3291  ;;  %v2693_v5 = vmul.f32 %v3290_v62, %v2469_v11  ;;  %2741 = vst [vmem:[%s4842_s24 + $0xf8] sm:$0xff] %v2709_v50 }
 0x38e   : > { %v3294_v51 = vpop.eup %3293  ;;  %v2692_v31 = vmul.f32 %v3292_v12, %v2468_v30 }
 0x38f   : > { %2725 = vst [vmem:[%s4842_s24 + $0x78] sm:$0xff] %v2693_v5  ;;  %v2708_v0 = vmul.f32 %v3294_v51, %v2484_v19 }
 0x390   : > { %2724 = vst [vmem:[%s4842_s24 + $0x70] sm:$0xff] %v2692_v31 }
 0x391   : > { %2740 = vst [vmem:[%s4842_s24 + $0xf0] sm:$0xff] %v2708_v0 }
 0x392   : > { %3318 = shalt.err (!%p3315_p5)
}
 0x393   : > { %s3319_s14 = scalar_lea.hbm %s5043_s11, 4096  ;;  %s3323_s17 = scalar_lea.hbm %s5104_s5, 8192 }
 0x394   : > { %p3320_p6 = scmp.ne.s32.totalorder %s5043_s11, %s3319_s14  ;;  %p3324_p10 = scmp.lt.u32.totalorder %s5043_s11, %s5104_s5 }
 0x395   : > { %p3325_p11 = scmp.lt.u32.totalorder %s3323_s17, %s3319_s14  ;;  %p3327_p13 = scmp.lt.u32.totalorder %s3319_s14, %s5043_s11 }
 0x396   : > { %p3321_p7 = pnand %p3320_p6, %p3465_p4 }
 0x397   : > { %p3326_p12 = por %p3325_p11, %p3324_p10 }
 0x398   : > { %p3322_p9 = pneg %p3321_p7 }
 0x399   : > { %p3328_p0 = por %p3327_p13, %p3326_p12 }
 0x39b   : > { %p3329_p1 = pnand %p3328_p0, %p3322_p9 }
 0x39d   : > { %3332 = shalt.err (!%p3329_p1)
}
 0x39e   : > { %s3394_s9 = smov 128  }
 0x39f   : > { %3102 = dma.vmem_to_hbm [thread:$0]  (%p3465_p4), %s5046_s29, 4096, %s5043_s11, %s5052_s21, %s3394_s9, %s3394_s9, %s3386_s13  }
 0x3a0 PF: > { %p3109_p2 = scmp.ge.s32.totalorder %s3383_s23, 2  ;;  %s2774_s10 = sand.u32 1, %s3363_s18  }
 0x3a1   : > { %s2775_s12 = scalar_lea.sflag [#allocation4], %s2774_s10 }
 0x3a2   : > { %p3105_p3 = pnand %p3109_p2, %p3472_p8 }
 0x3a4   : > { %3358 = dma.done.wait (!%p3105_p3), %s2775_s12, 4096  }
 0x3a5   : > { %3360 = vsyncadd (!%p3105_p3), %s2775_s12, 4294963200  ;;  %s18_s23 = sadd.s32 1, %s3383_s23   ;;  %s5220_s18 = smov %s3367_s19 }
 0x3a6   : > { %p15_p5 = scmp.ge.s32.totalorder %s18_s23, 4   ;;  %s5221_s19 = smov %s3371_s20 }
 0x3a7   : > { %s5222_s20 = smov %s3478_s6  ;;  %s5223_s21 = smov %s3379_s22 }
 0x3a8   : > { %s5224_s22 = smov %s5226_s26  ;;  %17 = sbr.rel (!%p15_p5) target bundleno = 4 (0x4), region = 90 }
 0x3af   :  { %2780 = vsyncpa [#allocation4], 1 }
 0x3b0   :  { %2782 = vsyncpa [#allocation4 + $0x1], 1 }

</bundles_post_ra>
